<compile_context>
chip_gen: v5e
topology: v5e:2x2
jax: 0.10.0
libtpu: 0.0.40
codegen_flags: <defaults>
</compile_context>

<pallas_src>
import numpy as np
import jax
import jax.numpy as jnp
from jax.experimental import pallas as pl
from jax.experimental.pallas import tpu as pltpu

BN_EPS = 1e-5

# Per-phase 2-tap H interpolation in REPLICATE-PADDED row coordinates.
# For output row oh = 4*ih + r, PyTorch bilinear (align_corners=False) uses the
# source coordinate ih + (2r - 3)/8; with a 1-row replicate pad this is exactly
#   wa * padded[ih + off] + wb * padded[ih + off + 1]
H_TAPS = (
    (0, 0.375, 0.625),   # r = 0
    (0, 0.125, 0.875),   # r = 1
    (1, 0.875, 0.125),   # r = 2
    (1, 0.625, 0.375),   # r = 3
)


def _bilinear_up4_matrix(size):
    """(4*size, size) bilinear x4 upsample matrix (PyTorch align_corners=False)."""
    u = np.zeros((4 * size, size), np.float32)
    for o in range(4 * size):
        src = max((o + 0.5) / 4.0 - 0.5, 0.0)
        i0 = int(np.floor(src))
        i1 = min(i0 + 1, size - 1)
        lam = src - i0
        u[o, i0] += 1.0 - lam
        u[o, i1] += lam
    return u


def double_factorized_increase(x, w_conv, *, bn_eps=BN_EPS, max_rows_per_tile=8):
    """x: (N, C_in, H, W) f32; w_conv: (C_out, C_in, 1, 1) PyTorch OIHW 1x1 weight.
    Returns (N, C_out, 4H, 4W) f32, matching the PyTorch module (training-mode BN)."""
    n, c_in, h, w = x.shape
    c_out = w_conv.shape[0]
    oh, ow = 4 * h, 4 * w

    # ---- H tiling: R input rows (4R output rows) per grid step ----------------
    # Pick the largest divisor of H (<= max_rows_per_tile) whose flattened output
    # tile is a multiple of 128 lanes; fall back to the whole image per step.
    r_rows = h
    for cand in range(1, min(h, max_rows_per_tile) + 1):
        if h % cand == 0 and (4 * cand * ow) % 128 == 0:
            r_rows = cand
    n_tiles = h // r_rows
    rows_out = 4 * r_rows
    lanes_out = rows_out * ow
    # TODO(synk): for very large W an additional OW tile axis (and a bf16 uw) is
    # needed to bound VMEM (uw is (W,4W) and per-tile activations scale with 4W).

    # ---- small-input prep (1/16 of the output size) ---------------------------
    # NCHW -> (N, H, C_in, W); replicate-pad H by 1 so the 2-tap H interpolation
    # needs no boundary cases; pre-halo into per-tile blocks of R+2 padded rows
    # and flatten (rows, C_in) so the kernel does ONE batched W-upsample matmul
    # per tile from a single (non-overlapping) input stream.
    xp = jnp.pad(jnp.transpose(x, (0, 2, 1, 3)),
                 ((0, 0), (1, 1), (0, 0), (0, 0)), mode="edge")        # (N, H+2, C_in, W)
    xt = jnp.stack([xp[:, r_rows * j: r_rows * j + r_rows + 2]
                    for j in range(n_tiles)], axis=1)                  # (N, T, R+2, C_in, W)
    xt = xt.reshape(n, n_tiles, (r_rows + 2) * c_in, w)

    uw = jnp.asarray(_bilinear_up4_matrix(w).T)                        # (W, 4W) f32
    w_f32 = w_conv[:, :, 0, 0]                                         # (C_out, C_in)
    w_bf16 = w_f32.astype(jnp.bfloat16)
    # NOTE: the Conv2d bias is folded away: training-mode BatchNorm with gamma=1 /
    # beta=0 subtracts the per-channel mean, cancelling a constant bias exactly.

    def fill_activation(x_ref, uw_ref, a_ref):
        """Bilinear x4 upsample + ReLU for one tile; writes A (C_in, 4R*OW) f32."""
        p = x_ref[0, 0]                                                # ((R+2)*C_in, W)
        wup = jnp.dot(p, uw_ref[...],
                      preferred_element_type=jnp.float32)              # ((R+2)*C_in, OW)
        for il in range(r_rows):
            rows3 = tuple(wup[(il + t) * c_in:(il + t + 1) * c_in] for t in range(3))
            for r in range(4):
                off, wa, wb = H_TAPS[r]
                up = wa * rows3[off] + wb * rows3[off + 1]             # (C_in, OW) f32
                k = 4 * il + r
                a_ref[:, k * ow:(k + 1) * ow] = jnp.maximum(up, 0.0)

    def stats_kernel(x_ref, uw_ref, out_ref, a_ref):
        # Per-(image, tile) partial stats of the ReLU'd activation:
        #   column 0   : sum_m a[c, m]
        #   columns 1+ : Gram  G[c, d] = sum_m a[c, m] * a[d, m]
        # The 1x1 conv / BN mean & var are folded in outside the kernel.
        fill_activation(x_ref, uw_ref, a_ref)
        a = a_ref[...]
        out_ref[0, 0, :, 0:1] = jnp.sum(a, axis=1, keepdims=True)
        out_ref[0, 0, :, 1:] = jax.lax.dot_general(
            a, a, (((1,), (1,)), ((), ())), preferred_element_type=jnp.float32)

    def main_kernel(x_ref, uw_ref, w_ref, scale_ref, shift_ref, o_ref, a_ref):
        # Upsample + ReLU + one batched 1x1-conv matmul + BN-apply; one
        # lane-dense (C_out, 4R*OW) store per grid step (NCHW-contiguous).
        fill_activation(x_ref, uw_ref, a_ref)
        y = jnp.dot(w_ref[...], a_ref[...].astype(jnp.bfloat16),
                    preferred_element_type=jnp.float32)                # (C_out, 4R*OW)
        o_ref[0] = y * scale_ref[...] + shift_ref[...]

    grid = (n, n_tiles)
    x_spec = pl.BlockSpec((1, 1, (r_rows + 2) * c_in, w), lambda i, j: (i, j, 0, 0))
    uw_spec = pl.BlockSpec((w, ow), lambda i, j: (0, 0))

    # ---- pass 1: BN statistics (activation sum + Gram; reads only small input) ----
    partial = pl.pallas_call(
        stats_kernel,
        out_shape=jax.ShapeDtypeStruct((n, n_tiles, c_in, c_in + 1), jnp.float32),
        grid=grid,
        in_specs=[x_spec, uw_spec],
        out_specs=pl.BlockSpec((1, 1, c_in, c_in + 1), lambda i, j: (i, j, 0, 0)),
        scratch_shapes=[pltpu.VMEM((c_in, lanes_out), jnp.float32)],
        compiler_params=pltpu.CompilerParams(
            dimension_semantics=("parallel", "parallel")),
    )(xt, uw)

    stats = jnp.sum(partial, axis=(0, 1))                              # (C_in, C_in+1)
    s_a, gram = stats[:, 0], stats[:, 1:]
    m_total = float(n * oh * ow)
    hp = jax.lax.Precision.HIGHEST
    mean = jnp.dot(w_f32, s_a, precision=hp) / m_total                 # (C_out,)
    ey2 = jnp.sum(jnp.dot(w_f32, gram, precision=hp) * w_f32, axis=1) / m_total
    var = jnp.maximum(ey2 - mean * mean, 0.0)                          # biased var (training BN)
    inv = jax.lax.rsqrt(var + bn_eps)
    scale = inv.reshape(c_out, 1)
    shift = (-mean * inv).reshape(c_out, 1)
    # TODO(synk): BatchNorm2d's running_mean / running_var side-state updates are
    # not produced; only the training-mode forward activation is returned.

    # ---- pass 2: fused upsample + relu + conv + BN-apply, NCHW written once -------
    out_flat = pl.pallas_call(
        main_kernel,
        out_shape=jax.ShapeDtypeStruct((n, c_out, oh * ow), jnp.float32),
        grid=grid,
        in_specs=[x_spec, uw_spec,
                  pl.BlockSpec((c_out, c_in), lambda i, j: (0, 0)),
                  pl.BlockSpec((c_out, 1), lambda i, j: (0, 0)),
                  pl.BlockSpec((c_out, 1), lambda i, j: (0, 0))],
        out_specs=pl.BlockSpec((1, c_out, lanes_out), lambda i, j: (i, 0, j)),
        scratch_shapes=[pltpu.VMEM((c_in, lanes_out), jnp.float32)],
        compiler_params=pltpu.CompilerParams(
            dimension_semantics=("parallel", "parallel")),
    )(xt, uw, w_bf16, scale, shift)

    # Free metadata reshape: (N, C_out, OH*OW) is already NCHW-contiguous.
    return out_flat.reshape(n, c_out, oh, ow)


def _reference(x, w_conv):
    """Pure-JAX reference: Upsample(x4, bilinear, align_corners=False) -> ReLU
    -> 1x1 conv -> training-mode BatchNorm (gamma=1, beta=0)."""
    n, c_in, h, w = x.shape
    uh = jnp.asarray(_bilinear_up4_matrix(h))
    uww = jnp.asarray(_bilinear_up4_matrix(w))
    hp = jax.lax.Precision.HIGHEST
    up = jnp.einsum('ph,nchw->ncpw', uh, x, precision=hp)
    up = jnp.einsum('qw,ncpw->ncpq', uww, up, precision=hp)
    a = jnp.maximum(up, 0.0)
    y = jnp.einsum('oc,ncpq->nopq', w_conv[:, :, 0, 0], a, precision=hp)
    mean = jnp.mean(y, axis=(0, 2, 3), keepdims=True)
    var = jnp.mean((y - mean) ** 2, axis=(0, 2, 3), keepdims=True)
    return (y - mean) * jax.lax.rsqrt(var + BN_EPS)


if __name__ == "__main__":
    N, C_IN, H, W = 2, 4, 16, 16
    C_OUT = 8

    key = jax.random.PRNGKey(0)
    kx, kw = jax.random.split(key)
    x = jax.random.normal(kx, (N, C_IN, H, W), dtype=jnp.float32)
    # kaiming_normal_ for a 1x1 conv: std = sqrt(2 / fan_in), fan_in = C_IN.
    w_conv = ((2.0 / C_IN) ** 0.5) * jax.random.normal(
        kw, (C_OUT, C_IN, 1, 1), dtype=jnp.float32)
    # Pre-round inputs/weights to bf16-representable values so the in-kernel
    # default-precision (bf16-operand) MXU matmuls lose nothing on the first
    # contraction and the kernel-vs-reference comparison stays tight.
    x = x.astype(jnp.bfloat16).astype(jnp.float32)
    w_conv = w_conv.astype(jnp.bfloat16).astype(jnp.float32)

    out = jax.jit(double_factorized_increase)(x, w_conv)
    out = jax.block_until_ready(out)
    assert out.shape == (N, C_OUT, 4 * H, 4 * W), out.shape

    ref = _reference(x, w_conv)
    # Tolerance covers TPU bf16-operand MXU matmuls inside the kernel vs the
    # HIGHEST-precision reference; any structural bug would show up as O(1)
    # errors on these unit-variance normalized outputs.
    assert jnp.allclose(out, ref, atol=1e-2, rtol=1e-2), \
        float(jnp.max(jnp.abs(out - ref)))

    print("KERNEL_OK")
</pallas_src>

<mosaic_0001>
module attributes {stable_mosaic.version = 11 : i64} {
  func.func @stats_kernel(%arg0: i32, %arg1: i32, %arg2: memref<1x1x40x16xf32, #tpu.memory_space<vmem>>, %arg3: memref<16x64xf32, #tpu.memory_space<vmem>>, %arg4: memref<1x1x4x5xf32, #tpu.memory_space<vmem>>, %arg5: memref<4x2048xf32, #tpu.memory_space<vmem>>) attributes {dimension_semantics = [#tpu.dimension_semantics<parallel>, #tpu.dimension_semantics<parallel>], iteration_bounds = array<i64: 2, 2>, scalar_prefetch = 0 : i64, scratch_operands = 1 : i64, tpu.core_type = #tpu.core_type<tc>, window_params = [{transform_indices = @transform_0, window_bounds = array<i64: 1, 1, 40, 16>}, {pipeline_mode = #tpu.pipeline_mode<synchronous>, transform_indices = @transform_1, window_bounds = array<i64: 16, 64>}, {transform_indices = @transform_2, window_bounds = array<i64: 1, 1, 4, 5>}]} {
    %c0 = arith.constant 0 : index
    %c0_0 = arith.constant 0 : index
    %c0_1 = arith.constant 0 : index
    %c0_2 = arith.constant 0 : index
    %0 = vector.load %arg2[%c0, %c0_0, %c0_1, %c0_2] : memref<1x1x40x16xf32, #tpu.memory_space<vmem>>, vector<1x1x40x16xf32>
    %1 = vector.shape_cast %0 : vector<1x1x40x16xf32> to vector<40x16xf32>
    %c0_3 = arith.constant 0 : index
    %c0_4 = arith.constant 0 : index
    %2 = vector.load %arg3[%c0_3, %c0_4] : memref<16x64xf32, #tpu.memory_space<vmem>>, vector<16x64xf32>
    %cst = arith.constant dense<0.000000e+00> : vector<40x64xf32>
    %3 = tpu.matmul %1, %2, %cst {dimension_numbers = #tpu.dot_dimension_numbers<[1], [0], [0], [1], [0, 0, 1, 1], [], []>} : vector<40x16xf32>, vector<16x64xf32>, vector<40x64xf32> -> vector<40x64xf32>
    %4 = vector.extract_strided_slice %3 {offsets = [0, 0], sizes = [4, 64], strides = [1, 1]} : vector<40x64xf32> to vector<4x64xf32>
    %5 = vector.extract_strided_slice %3 {offsets = [4, 0], sizes = [4, 64], strides = [1, 1]} : vector<40x64xf32> to vector<4x64xf32>
    %6 = vector.extract_strided_slice %3 {offsets = [8, 0], sizes = [4, 64], strides = [1, 1]} : vector<40x64xf32> to vector<4x64xf32>
    %cst_5 = arith.constant 3.750000e-01 : f32
    %7 = vector.broadcast %cst_5 : f32 to vector<4x64xf32>
    %8 = arith.mulf %7, %4 : vector<4x64xf32>
    %cst_6 = arith.constant 6.250000e-01 : f32
    %9 = vector.broadcast %cst_6 : f32 to vector<4x64xf32>
    %10 = arith.mulf %9, %5 : vector<4x64xf32>
    %11 = arith.addf %8, %10 : vector<4x64xf32>
    %cst_7 = arith.constant 0.000000e+00 : f32
    %12 = vector.broadcast %cst_7 : f32 to vector<4x64xf32>
    %13 = arith.maximumf %11, %12 : vector<4x64xf32>
    %c0_8 = arith.constant 0 : index
    %c0_9 = arith.constant 0 : index
    %14 = vector.load %arg5[%c0_8, %c0_9] : memref<4x2048xf32, #tpu.memory_space<vmem>>, vector<4x64xf32>
    tpu.vector_store %arg5[%c0_8, %c0_9], %13 {strides = array<i32>} : memref<4x2048xf32, #tpu.memory_space<vmem>>, vector<4x64xf32>,
    %cst_10 = arith.constant 1.250000e-01 : f32
    %15 = vector.broadcast %cst_10 : f32 to vector<4x64xf32>
    %16 = arith.mulf %15, %4 : vector<4x64xf32>
    %cst_11 = arith.constant 8.750000e-01 : f32
    %17 = vector.broadcast %cst_11 : f32 to vector<4x64xf32>
    %18 = arith.mulf %17, %5 : vector<4x64xf32>
    %19 = arith.addf %16, %18 : vector<4x64xf32>
    %cst_12 = arith.constant 0.000000e+00 : f32
    %20 = vector.broadcast %cst_12 : f32 to vector<4x64xf32>
    %21 = arith.maximumf %19, %20 : vector<4x64xf32>
    %c0_13 = arith.constant 0 : index
    %c64 = arith.constant 64 : index
    %22 = vector.load %arg5[%c0_13, %c64] : memref<4x2048xf32, #tpu.memory_space<vmem>>, vector<4x64xf32>
    tpu.vector_store %arg5[%c0_13, %c64], %21 {strides = array<i32>} : memref<4x2048xf32, #tpu.memory_space<vmem>>, vector<4x64xf32>,
    %cst_14 = arith.constant 8.750000e-01 : f32
    %23 = vector.broadcast %cst_14 : f32 to vector<4x64xf32>
    %24 = arith.mulf %23, %5 : vector<4x64xf32>
    %cst_15 = arith.constant 1.250000e-01 : f32
    %25 = vector.broadcast %cst_15 : f32 to vector<4x64xf32>
    %26 = arith.mulf %25, %6 : vector<4x64xf32>
    %27 = arith.addf %24, %26 : vector<4x64xf32>
    %cst_16 = arith.constant 0.000000e+00 : f32
    %28 = vector.broadcast %cst_16 : f32 to vector<4x64xf32>
    %29 = arith.maximumf %27, %28 : vector<4x64xf32>
    %c0_17 = arith.constant 0 : index
    %c128 = arith.constant 128 : index
    %30 = vector.load %arg5[%c0_17, %c128] : memref<4x2048xf32, #tpu.memory_space<vmem>>, vector<4x64xf32>
    tpu.vector_store %arg5[%c0_17, %c128], %29 {strides = array<i32>} : memref<4x2048xf32, #tpu.memory_space<vmem>>, vector<4x64xf32>,
    %cst_18 = arith.constant 6.250000e-01 : f32
    %31 = vector.broadcast %cst_18 : f32 to vector<4x64xf32>
    %32 = arith.mulf %31, %5 : vector<4x64xf32>
    %cst_19 = arith.constant 3.750000e-01 : f32
    %33 = vector.broadcast %cst_19 : f32 to vector<4x64xf32>
    %34 = arith.mulf %33, %6 : vector<4x64xf32>
    %35 = arith.addf %32, %34 : vector<4x64xf32>
    %cst_20 = arith.constant 0.000000e+00 : f32
    %36 = vector.broadcast %cst_20 : f32 to vector<4x64xf32>
    %37 = arith.maximumf %35, %36 : vector<4x64xf32>
    %c0_21 = arith.constant 0 : index
    %c192 = arith.constant 192 : index
    %38 = vector.load %arg5[%c0_21, %c192] : memref<4x2048xf32, #tpu.memory_space<vmem>>, vector<4x64xf32>
    tpu.vector_store %arg5[%c0_21, %c192], %37 {strides = array<i32>} : memref<4x2048xf32, #tpu.memory_space<vmem>>, vector<4x64xf32>,
    %39 = vector.extract_strided_slice %3 {offsets = [4, 0], sizes = [4, 64], strides = [1, 1]} : vector<40x64xf32> to vector<4x64xf32>
    %40 = vector.extract_strided_slice %3 {offsets = [8, 0], sizes = [4, 64], strides = [1, 1]} : vector<40x64xf32> to vector<4x64xf32>
    %41 = vector.extract_strided_slice %3 {offsets = [12, 0], sizes = [4, 64], strides = [1, 1]} : vector<40x64xf32> to vector<4x64xf32>
    %cst_22 = arith.constant 3.750000e-01 : f32
    %42 = vector.broadcast %cst_22 : f32 to vector<4x64xf32>
    %43 = arith.mulf %42, %39 : vector<4x64xf32>
    %cst_23 = arith.constant 6.250000e-01 : f32
    %44 = vector.broadcast %cst_23 : f32 to vector<4x64xf32>
    %45 = arith.mulf %44, %40 : vector<4x64xf32>
    %46 = arith.addf %43, %45 : vector<4x64xf32>
    %cst_24 = arith.constant 0.000000e+00 : f32
    %47 = vector.broadcast %cst_24 : f32 to vector<4x64xf32>
    %48 = arith.maximumf %46, %47 : vector<4x64xf32>
    %c0_25 = arith.constant 0 : index
    %c256 = arith.constant 256 : index
    %49 = vector.load %arg5[%c0_25, %c256] : memref<4x2048xf32, #tpu.memory_space<vmem>>, vector<4x64xf32>
    tpu.vector_store %arg5[%c0_25, %c256], %48 {strides = array<i32>} : memref<4x2048xf32, #tpu.memory_space<vmem>>, vector<4x64xf32>,
    %cst_26 = arith.constant 1.250000e-01 : f32
    %50 = vector.broadcast %cst_26 : f32 to vector<4x64xf32>
    %51 = arith.mulf %50, %39 : vector<4x64xf32>
    %cst_27 = arith.constant 8.750000e-01 : f32
    %52 = vector.broadcast %cst_27 : f32 to vector<4x64xf32>
    %53 = arith.mulf %52, %40 : vector<4x64xf32>
    %54 = arith.addf %51, %53 : vector<4x64xf32>
    %cst_28 = arith.constant 0.000000e+00 : f32
    %55 = vector.broadcast %cst_28 : f32 to vector<4x64xf32>
    %56 = arith.maximumf %54, %55 : vector<4x64xf32>
    %c0_29 = arith.constant 0 : index
    %c320 = arith.constant 320 : index
    %57 = vector.load %arg5[%c0_29, %c320] : memref<4x2048xf32, #tpu.memory_space<vmem>>, vector<4x64xf32>
    tpu.vector_store %arg5[%c0_29, %c320], %56 {strides = array<i32>} : memref<4x2048xf32, #tpu.memory_space<vmem>>, vector<4x64xf32>,
    %cst_30 = arith.constant 8.750000e-01 : f32
    %58 = vector.broadcast %cst_30 : f32 to vector<4x64xf32>
    %59 = arith.mulf %58, %40 : vector<4x64xf32>
    %cst_31 = arith.constant 1.250000e-01 : f32
    %60 = vector.broadcast %cst_31 : f32 to vector<4x64xf32>
    %61 = arith.mulf %60, %41 : vector<4x64xf32>
    %62 = arith.addf %59, %61 : vector<4x64xf32>
    %cst_32 = arith.constant 0.000000e+00 : f32
    %63 = vector.broadcast %cst_32 : f32 to vector<4x64xf32>
    %64 = arith.maximumf %62, %63 : vector<4x64xf32>
    %c0_33 = arith.constant 0 : index
    %c384 = arith.constant 384 : index
    %65 = vector.load %arg5[%c0_33, %c384] : memref<4x2048xf32, #tpu.memory_space<vmem>>, vector<4x64xf32>
    tpu.vector_store %arg5[%c0_33, %c384], %64 {strides = array<i32>} : memref<4x2048xf32, #tpu.memory_space<vmem>>, vector<4x64xf32>,
    %cst_34 = arith.constant 6.250000e-01 : f32
    %66 = vector.broadcast %cst_34 : f32 to vector<4x64xf32>
    %67 = arith.mulf %66, %40 : vector<4x64xf32>
    %cst_35 = arith.constant 3.750000e-01 : f32
    %68 = vector.broadcast %cst_35 : f32 to vector<4x64xf32>
    %69 = arith.mulf %68, %41 : vector<4x64xf32>
    %70 = arith.addf %67, %69 : vector<4x64xf32>
    %cst_36 = arith.constant 0.000000e+00 : f32
    %71 = vector.broadcast %cst_36 : f32 to vector<4x64xf32>
    %72 = arith.maximumf %70, %71 : vector<4x64xf32>
    %c0_37 = arith.constant 0 : index
    %c448 = arith.constant 448 : index
    %73 = vector.load %arg5[%c0_37, %c448] : memref<4x2048xf32, #tpu.memory_space<vmem>>, vector<4x64xf32>
    tpu.vector_store %arg5[%c0_37, %c448], %72 {strides = array<i32>} : memref<4x2048xf32, #tpu.memory_space<vmem>>, vector<4x64xf32>,
    %74 = vector.extract_strided_slice %3 {offsets = [8, 0], sizes = [4, 64], strides = [1, 1]} : vector<40x64xf32> to vector<4x64xf32>
    %75 = vector.extract_strided_slice %3 {offsets = [12, 0], sizes = [4, 64], strides = [1, 1]} : vector<40x64xf32> to vector<4x64xf32>
    %76 = vector.extract_strided_slice %3 {offsets = [16, 0], sizes = [4, 64], strides = [1, 1]} : vector<40x64xf32> to vector<4x64xf32>
    %cst_38 = arith.constant 3.750000e-01 : f32
    %77 = vector.broadcast %cst_38 : f32 to vector<4x64xf32>
    %78 = arith.mulf %77, %74 : vector<4x64xf32>
    %cst_39 = arith.constant 6.250000e-01 : f32
    %79 = vector.broadcast %cst_39 : f32 to vector<4x64xf32>
    %80 = arith.mulf %79, %75 : vector<4x64xf32>
    %81 = arith.addf %78, %80 : vector<4x64xf32>
    %cst_40 = arith.constant 0.000000e+00 : f32
    %82 = vector.broadcast %cst_40 : f32 to vector<4x64xf32>
    %83 = arith.maximumf %81, %82 : vector<4x64xf32>
    %c0_41 = arith.constant 0 : index
    %c512 = arith.constant 512 : index
    %84 = vector.load %arg5[%c0_41, %c512] : memref<4x2048xf32, #tpu.memory_space<vmem>>, vector<4x64xf32>
    tpu.vector_store %arg5[%c0_41, %c512], %83 {strides = array<i32>} : memref<4x2048xf32, #tpu.memory_space<vmem>>, vector<4x64xf32>,
    %cst_42 = arith.constant 1.250000e-01 : f32
    %85 = vector.broadcast %cst_42 : f32 to vector<4x64xf32>
    %86 = arith.mulf %85, %74 : vector<4x64xf32>
    %cst_43 = arith.constant 8.750000e-01 : f32
    %87 = vector.broadcast %cst_43 : f32 to vector<4x64xf32>
    %88 = arith.mulf %87, %75 : vector<4x64xf32>
    %89 = arith.addf %86, %88 : vector<4x64xf32>
    %cst_44 = arith.constant 0.000000e+00 : f32
    %90 = vector.broadcast %cst_44 : f32 to vector<4x64xf32>
    %91 = arith.maximumf %89, %90 : vector<4x64xf32>
    %c0_45 = arith.constant 0 : index
    %c576 = arith.constant 576 : index
    %92 = vector.load %arg5[%c0_45, %c576] : memref<4x2048xf32, #tpu.memory_space<vmem>>, vector<4x64xf32>
    tpu.vector_store %arg5[%c0_45, %c576], %91 {strides = array<i32>} : memref<4x2048xf32, #tpu.memory_space<vmem>>, vector<4x64xf32>,
    %cst_46 = arith.constant 8.750000e-01 : f32
    %93 = vector.broadcast %cst_46 : f32 to vector<4x64xf32>
    %94 = arith.mulf %93, %75 : vector<4x64xf32>
    %cst_47 = arith.constant 1.250000e-01 : f32
    %95 = vector.broadcast %cst_47 : f32 to vector<4x64xf32>
    %96 = arith.mulf %95, %76 : vector<4x64xf32>
    %97 = arith.addf %94, %96 : vector<4x64xf32>
    %cst_48 = arith.constant 0.000000e+00 : f32
    %98 = vector.broadcast %cst_48 : f32 to vector<4x64xf32>
    %99 = arith.maximumf %97, %98 : vector<4x64xf32>
    %c0_49 = arith.constant 0 : index
    %c640 = arith.constant 640 : index
    %100 = vector.load %arg5[%c0_49, %c640] : memref<4x2048xf32, #tpu.memory_space<vmem>>, vector<4x64xf32>
    tpu.vector_store %arg5[%c0_49, %c640], %99 {strides = array<i32>} : memref<4x2048xf32, #tpu.memory_space<vmem>>, vector<4x64xf32>,
    %cst_50 = arith.constant 6.250000e-01 : f32
    %101 = vector.broadcast %cst_50 : f32 to vector<4x64xf32>
    %102 = arith.mulf %101, %75 : vector<4x64xf32>
    %cst_51 = arith.constant 3.750000e-01 : f32
    %103 = vector.broadcast %cst_51 : f32 to vector<4x64xf32>
    %104 = arith.mulf %103, %76 : vector<4x64xf32>
    %105 = arith.addf %102, %104 : vector<4x64xf32>
    %cst_52 = arith.constant 0.000000e+00 : f32
    %106 = vector.broadcast %cst_52 : f32 to vector<4x64xf32>
    %107 = arith.maximumf %105, %106 : vector<4x64xf32>
    %c0_53 = arith.constant 0 : index
    %c704 = arith.constant 704 : index
    %108 = vector.load %arg5[%c0_53, %c704] : memref<4x2048xf32, #tpu.memory_space<vmem>>, vector<4x64xf32>
    tpu.vector_store %arg5[%c0_53, %c704], %107 {strides = array<i32>} : memref<4x2048xf32, #tpu.memory_space<vmem>>, vector<4x64xf32>,
    %109 = vector.extract_strided_slice %3 {offsets = [12, 0], sizes = [4, 64], strides = [1, 1]} : vector<40x64xf32> to vector<4x64xf32>
    %110 = vector.extract_strided_slice %3 {offsets = [16, 0], sizes = [4, 64], strides = [1, 1]} : vector<40x64xf32> to vector<4x64xf32>
    %111 = vector.extract_strided_slice %3 {offsets = [20, 0], sizes = [4, 64], strides = [1, 1]} : vector<40x64xf32> to vector<4x64xf32>
    %cst_54 = arith.constant 3.750000e-01 : f32
    %112 = vector.broadcast %cst_54 : f32 to vector<4x64xf32>
    %113 = arith.mulf %112, %109 : vector<4x64xf32>
    %cst_55 = arith.constant 6.250000e-01 : f32
    %114 = vector.broadcast %cst_55 : f32 to vector<4x64xf32>
    %115 = arith.mulf %114, %110 : vector<4x64xf32>
    %116 = arith.addf %113, %115 : vector<4x64xf32>
    %cst_56 = arith.constant 0.000000e+00 : f32
    %117 = vector.broadcast %cst_56 : f32 to vector<4x64xf32>
    %118 = arith.maximumf %116, %117 : vector<4x64xf32>
    %c0_57 = arith.constant 0 : index
    %c768 = arith.constant 768 : index
    %119 = vector.load %arg5[%c0_57, %c768] : memref<4x2048xf32, #tpu.memory_space<vmem>>, vector<4x64xf32>
    tpu.vector_store %arg5[%c0_57, %c768], %118 {strides = array<i32>} : memref<4x2048xf32, #tpu.memory_space<vmem>>, vector<4x64xf32>,
    %cst_58 = arith.constant 1.250000e-01 : f32
    %120 = vector.broadcast %cst_58 : f32 to vector<4x64xf32>
    %121 = arith.mulf %120, %109 : vector<4x64xf32>
    %cst_59 = arith.constant 8.750000e-01 : f32
    %122 = vector.broadcast %cst_59 : f32 to vector<4x64xf32>
    %123 = arith.mulf %122, %110 : vector<4x64xf32>
    %124 = arith.addf %121, %123 : vector<4x64xf32>
    %cst_60 = arith.constant 0.000000e+00 : f32
    %125 = vector.broadcast %cst_60 : f32 to vector<4x64xf32>
    %126 = arith.maximumf %124, %125 : vector<4x64xf32>
    %c0_61 = arith.constant 0 : index
    %c832 = arith.constant 832 : index
    %127 = vector.load %arg5[%c0_61, %c832] : memref<4x2048xf32, #tpu.memory_space<vmem>>, vector<4x64xf32>
    tpu.vector_store %arg5[%c0_61, %c832], %126 {strides = array<i32>} : memref<4x2048xf32, #tpu.memory_space<vmem>>, vector<4x64xf32>,
    %cst_62 = arith.constant 8.750000e-01 : f32
    %128 = vector.broadcast %cst_62 : f32 to vector<4x64xf32>
    %129 = arith.mulf %128, %110 : vector<4x64xf32>
    %cst_63 = arith.constant 1.250000e-01 : f32
    %130 = vector.broadcast %cst_63 : f32 to vector<4x64xf32>
    %131 = arith.mulf %130, %111 : vector<4x64xf32>
    %132 = arith.addf %129, %131 : vector<4x64xf32>
    %cst_64 = arith.constant 0.000000e+00 : f32
    %133 = vector.broadcast %cst_64 : f32 to vector<4x64xf32>
    %134 = arith.maximumf %132, %133 : vector<4x64xf32>
    %c0_65 = arith.constant 0 : index
    %c896 = arith.constant 896 : index
    %135 = vector.load %arg5[%c0_65, %c896] : memref<4x2048xf32, #tpu.memory_space<vmem>>, vector<4x64xf32>
    tpu.vector_store %arg5[%c0_65, %c896], %134 {strides = array<i32>} : memref<4x2048xf32, #tpu.memory_space<vmem>>, vector<4x64xf32>,
    %cst_66 = arith.constant 6.250000e-01 : f32
    %136 = vector.broadcast %cst_66 : f32 to vector<4x64xf32>
    %137 = arith.mulf %136, %110 : vector<4x64xf32>
    %cst_67 = arith.constant 3.750000e-01 : f32
    %138 = vector.broadcast %cst_67 : f32 to vector<4x64xf32>
    %139 = arith.mulf %138, %111 : vector<4x64xf32>
    %140 = arith.addf %137, %139 : vector<4x64xf32>
    %cst_68 = arith.constant 0.000000e+00 : f32
    %141 = vector.broadcast %cst_68 : f32 to vector<4x64xf32>
    %142 = arith.maximumf %140, %141 : vector<4x64xf32>
    %c0_69 = arith.constant 0 : index
    %c960 = arith.constant 960 : index
    %143 = vector.load %arg5[%c0_69, %c960] : memref<4x2048xf32, #tpu.memory_space<vmem>>, vector<4x64xf32>
    tpu.vector_store %arg5[%c0_69, %c960], %142 {strides = array<i32>} : memref<4x2048xf32, #tpu.memory_space<vmem>>, vector<4x64xf32>,
    %144 = vector.extract_strided_slice %3 {offsets = [16, 0], sizes = [4, 64], strides = [1, 1]} : vector<40x64xf32> to vector<4x64xf32>
    %145 = vector.extract_strided_slice %3 {offsets = [20, 0], sizes = [4, 64], strides = [1, 1]} : vector<40x64xf32> to vector<4x64xf32>
    %146 = vector.extract_strided_slice %3 {offsets = [24, 0], sizes = [4, 64], strides = [1, 1]} : vector<40x64xf32> to vector<4x64xf32>
    %cst_70 = arith.constant 3.750000e-01 : f32
    %147 = vector.broadcast %cst_70 : f32 to vector<4x64xf32>
    %148 = arith.mulf %147, %144 : vector<4x64xf32>
    %cst_71 = arith.constant 6.250000e-01 : f32
    %149 = vector.broadcast %cst_71 : f32 to vector<4x64xf32>
    %150 = arith.mulf %149, %145 : vector<4x64xf32>
    %151 = arith.addf %148, %150 : vector<4x64xf32>
    %cst_72 = arith.constant 0.000000e+00 : f32
    %152 = vector.broadcast %cst_72 : f32 to vector<4x64xf32>
    %153 = arith.maximumf %151, %152 : vector<4x64xf32>
    %c0_73 = arith.constant 0 : index
    %c1024 = arith.constant 1024 : index
    %154 = vector.load %arg5[%c0_73, %c1024] : memref<4x2048xf32, #tpu.memory_space<vmem>>, vector<4x64xf32>
    tpu.vector_store %arg5[%c0_73, %c1024], %153 {strides = array<i32>} : memref<4x2048xf32, #tpu.memory_space<vmem>>, vector<4x64xf32>,
    %cst_74 = arith.constant 1.250000e-01 : f32
    %155 = vector.broadcast %cst_74 : f32 to vector<4x64xf32>
    %156 = arith.mulf %155, %144 : vector<4x64xf32>
    %cst_75 = arith.constant 8.750000e-01 : f32
    %157 = vector.broadcast %cst_75 : f32 to vector<4x64xf32>
    %158 = arith.mulf %157, %145 : vector<4x64xf32>
    %159 = arith.addf %156, %158 : vector<4x64xf32>
    %cst_76 = arith.constant 0.000000e+00 : f32
    %160 = vector.broadcast %cst_76 : f32 to vector<4x64xf32>
    %161 = arith.maximumf %159, %160 : vector<4x64xf32>
    %c0_77 = arith.constant 0 : index
    %c1088 = arith.constant 1088 : index
    %162 = vector.load %arg5[%c0_77, %c1088] : memref<4x2048xf32, #tpu.memory_space<vmem>>, vector<4x64xf32>
    tpu.vector_store %arg5[%c0_77, %c1088], %161 {strides = array<i32>} : memref<4x2048xf32, #tpu.memory_space<vmem>>, vector<4x64xf32>,
    %cst_78 = arith.constant 8.750000e-01 : f32
    %163 = vector.broadcast %cst_78 : f32 to vector<4x64xf32>
    %164 = arith.mulf %163, %145 : vector<4x64xf32>
    %cst_79 = arith.constant 1.250000e-01 : f32
    %165 = vector.broadcast %cst_79 : f32 to vector<4x64xf32>
    %166 = arith.mulf %165, %146 : vector<4x64xf32>
    %167 = arith.addf %164, %166 : vector<4x64xf32>
    %cst_80 = arith.constant 0.000000e+00 : f32
    %168 = vector.broadcast %cst_80 : f32 to vector<4x64xf32>
    %169 = arith.maximumf %167, %168 : vector<4x64xf32>
    %c0_81 = arith.constant 0 : index
    %c1152 = arith.constant 1152 : index
    %170 = vector.load %arg5[%c0_81, %c1152] : memref<4x2048xf32, #tpu.memory_space<vmem>>, vector<4x64xf32>
    tpu.vector_store %arg5[%c0_81, %c1152], %169 {strides = array<i32>} : memref<4x2048xf32, #tpu.memory_space<vmem>>, vector<4x64xf32>,
    %cst_82 = arith.constant 6.250000e-01 : f32
    %171 = vector.broadcast %cst_82 : f32 to vector<4x64xf32>
    %172 = arith.mulf %171, %145 : vector<4x64xf32>
    %cst_83 = arith.constant 3.750000e-01 : f32
    %173 = vector.broadcast %cst_83 : f32 to vector<4x64xf32>
    %174 = arith.mulf %173, %146 : vector<4x64xf32>
    %175 = arith.addf %172, %174 : vector<4x64xf32>
    %cst_84 = arith.constant 0.000000e+00 : f32
    %176 = vector.broadcast %cst_84 : f32 to vector<4x64xf32>
    %177 = arith.maximumf %175, %176 : vector<4x64xf32>
    %c0_85 = arith.constant 0 : index
    %c1216 = arith.constant 1216 : index
    %178 = vector.load %arg5[%c0_85, %c1216] : memref<4x2048xf32, #tpu.memory_space<vmem>>, vector<4x64xf32>
    tpu.vector_store %arg5[%c0_85, %c1216], %177 {strides = array<i32>} : memref<4x2048xf32, #tpu.memory_space<vmem>>, vector<4x64xf32>,
    %179 = vector.extract_strided_slice %3 {offsets = [20, 0], sizes = [4, 64], strides = [1, 1]} : vector<40x64xf32> to vector<4x64xf32>
    %180 = vector.extract_strided_slice %3 {offsets = [24, 0], sizes = [4, 64], strides = [1, 1]} : vector<40x64xf32> to vector<4x64xf32>
    %181 = vector.extract_strided_slice %3 {offsets = [28, 0], sizes = [4, 64], strides = [1, 1]} : vector<40x64xf32> to vector<4x64xf32>
    %cst_86 = arith.constant 3.750000e-01 : f32
    %182 = vector.broadcast %cst_86 : f32 to vector<4x64xf32>
    %183 = arith.mulf %182, %179 : vector<4x64xf32>
    %cst_87 = arith.constant 6.250000e-01 : f32
    %184 = vector.broadcast %cst_87 : f32 to vector<4x64xf32>
    %185 = arith.mulf %184, %180 : vector<4x64xf32>
    %186 = arith.addf %183, %185 : vector<4x64xf32>
    %cst_88 = arith.constant 0.000000e+00 : f32
    %187 = vector.broadcast %cst_88 : f32 to vector<4x64xf32>
    %188 = arith.maximumf %186, %187 : vector<4x64xf32>
    %c0_89 = arith.constant 0 : index
    %c1280 = arith.constant 1280 : index
    %189 = vector.load %arg5[%c0_89, %c1280] : memref<4x2048xf32, #tpu.memory_space<vmem>>, vector<4x64xf32>
    tpu.vector_store %arg5[%c0_89, %c1280], %188 {strides = array<i32>} : memref<4x2048xf32, #tpu.memory_space<vmem>>, vector<4x64xf32>,
    %cst_90 = arith.constant 1.250000e-01 : f32
    %190 = vector.broadcast %cst_90 : f32 to vector<4x64xf32>
    %191 = arith.mulf %190, %179 : vector<4x64xf32>
    %cst_91 = arith.constant 8.750000e-01 : f32
    %192 = vector.broadcast %cst_91 : f32 to vector<4x64xf32>
    %193 = arith.mulf %192, %180 : vector<4x64xf32>
    %194 = arith.addf %191, %193 : vector<4x64xf32>
    %cst_92 = arith.constant 0.000000e+00 : f32
    %195 = vector.broadcast %cst_92 : f32 to vector<4x64xf32>
    %196 = arith.maximumf %194, %195 : vector<4x64xf32>
    %c0_93 = arith.constant 0 : index
    %c1344 = arith.constant 1344 : index
    %197 = vector.load %arg5[%c0_93, %c1344] : memref<4x2048xf32, #tpu.memory_space<vmem>>, vector<4x64xf32>
    tpu.vector_store %arg5[%c0_93, %c1344], %196 {strides = array<i32>} : memref<4x2048xf32, #tpu.memory_space<vmem>>, vector<4x64xf32>,
    %cst_94 = arith.constant 8.750000e-01 : f32
    %198 = vector.broadcast %cst_94 : f32 to vector<4x64xf32>
    %199 = arith.mulf %198, %180 : vector<4x64xf32>
    %cst_95 = arith.constant 1.250000e-01 : f32
    %200 = vector.broadcast %cst_95 : f32 to vector<4x64xf32>
    %201 = arith.mulf %200, %181 : vector<4x64xf32>
    %202 = arith.addf %199, %201 : vector<4x64xf32>
    %cst_96 = arith.constant 0.000000e+00 : f32
    %203 = vector.broadcast %cst_96 : f32 to vector<4x64xf32>
    %204 = arith.maximumf %202, %203 : vector<4x64xf32>
    %c0_97 = arith.constant 0 : index
    %c1408 = arith.constant 1408 : index
    %205 = vector.load %arg5[%c0_97, %c1408] : memref<4x2048xf32, #tpu.memory_space<vmem>>, vector<4x64xf32>
    tpu.vector_store %arg5[%c0_97, %c1408], %204 {strides = array<i32>} : memref<4x2048xf32, #tpu.memory_space<vmem>>, vector<4x64xf32>,
    %cst_98 = arith.constant 6.250000e-01 : f32
    %206 = vector.broadcast %cst_98 : f32 to vector<4x64xf32>
    %207 = arith.mulf %206, %180 : vector<4x64xf32>
    %cst_99 = arith.constant 3.750000e-01 : f32
    %208 = vector.broadcast %cst_99 : f32 to vector<4x64xf32>
    %209 = arith.mulf %208, %181 : vector<4x64xf32>
    %210 = arith.addf %207, %209 : vector<4x64xf32>
    %cst_100 = arith.constant 0.000000e+00 : f32
    %211 = vector.broadcast %cst_100 : f32 to vector<4x64xf32>
    %212 = arith.maximumf %210, %211 : vector<4x64xf32>
    %c0_101 = arith.constant 0 : index
    %c1472 = arith.constant 1472 : index
    %213 = vector.load %arg5[%c0_101, %c1472] : memref<4x2048xf32, #tpu.memory_space<vmem>>, vector<4x64xf32>
    tpu.vector_store %arg5[%c0_101, %c1472], %212 {strides = array<i32>} : memref<4x2048xf32, #tpu.memory_space<vmem>>, vector<4x64xf32>,
    %214 = vector.extract_strided_slice %3 {offsets = [24, 0], sizes = [4, 64], strides = [1, 1]} : vector<40x64xf32> to vector<4x64xf32>
    %215 = vector.extract_strided_slice %3 {offsets = [28, 0], sizes = [4, 64], strides = [1, 1]} : vector<40x64xf32> to vector<4x64xf32>
    %216 = vector.extract_strided_slice %3 {offsets = [32, 0], sizes = [4, 64], strides = [1, 1]} : vector<40x64xf32> to vector<4x64xf32>
    %cst_102 = arith.constant 3.750000e-01 : f32
    %217 = vector.broadcast %cst_102 : f32 to vector<4x64xf32>
    %218 = arith.mulf %217, %214 : vector<4x64xf32>
    %cst_103 = arith.constant 6.250000e-01 : f32
    %219 = vector.broadcast %cst_103 : f32 to vector<4x64xf32>
    %220 = arith.mulf %219, %215 : vector<4x64xf32>
    %221 = arith.addf %218, %220 : vector<4x64xf32>
    %cst_104 = arith.constant 0.000000e+00 : f32
    %222 = vector.broadcast %cst_104 : f32 to vector<4x64xf32>
    %223 = arith.maximumf %221, %222 : vector<4x64xf32>
    %c0_105 = arith.constant 0 : index
    %c1536 = arith.constant 1536 : index
    %224 = vector.load %arg5[%c0_105, %c1536] : memref<4x2048xf32, #tpu.memory_space<vmem>>, vector<4x64xf32>
    tpu.vector_store %arg5[%c0_105, %c1536], %223 {strides = array<i32>} : memref<4x2048xf32, #tpu.memory_space<vmem>>, vector<4x64xf32>,
    %cst_106 = arith.constant 1.250000e-01 : f32
    %225 = vector.broadcast %cst_106 : f32 to vector<4x64xf32>
    %226 = arith.mulf %225, %214 : vector<4x64xf32>
    %cst_107 = arith.constant 8.750000e-01 : f32
    %227 = vector.broadcast %cst_107 : f32 to vector<4x64xf32>
    %228 = arith.mulf %227, %215 : vector<4x64xf32>
    %229 = arith.addf %226, %228 : vector<4x64xf32>
    %cst_108 = arith.constant 0.000000e+00 : f32
    %230 = vector.broadcast %cst_108 : f32 to vector<4x64xf32>
    %231 = arith.maximumf %229, %230 : vector<4x64xf32>
    %c0_109 = arith.constant 0 : index
    %c1600 = arith.constant 1600 : index
    %232 = vector.load %arg5[%c0_109, %c1600] : memref<4x2048xf32, #tpu.memory_space<vmem>>, vector<4x64xf32>
    tpu.vector_store %arg5[%c0_109, %c1600], %231 {strides = array<i32>} : memref<4x2048xf32, #tpu.memory_space<vmem>>, vector<4x64xf32>,
    %cst_110 = arith.constant 8.750000e-01 : f32
    %233 = vector.broadcast %cst_110 : f32 to vector<4x64xf32>
    %234 = arith.mulf %233, %215 : vector<4x64xf32>
    %cst_111 = arith.constant 1.250000e-01 : f32
    %235 = vector.broadcast %cst_111 : f32 to vector<4x64xf32>
    %236 = arith.mulf %235, %216 : vector<4x64xf32>
    %237 = arith.addf %234, %236 : vector<4x64xf32>
    %cst_112 = arith.constant 0.000000e+00 : f32
    %238 = vector.broadcast %cst_112 : f32 to vector<4x64xf32>
    %239 = arith.maximumf %237, %238 : vector<4x64xf32>
    %c0_113 = arith.constant 0 : index
    %c1664 = arith.constant 1664 : index
    %240 = vector.load %arg5[%c0_113, %c1664] : memref<4x2048xf32, #tpu.memory_space<vmem>>, vector<4x64xf32>
    tpu.vector_store %arg5[%c0_113, %c1664], %239 {strides = array<i32>} : memref<4x2048xf32, #tpu.memory_space<vmem>>, vector<4x64xf32>,
    %cst_114 = arith.constant 6.250000e-01 : f32
    %241 = vector.broadcast %cst_114 : f32 to vector<4x64xf32>
    %242 = arith.mulf %241, %215 : vector<4x64xf32>
    %cst_115 = arith.constant 3.750000e-01 : f32
    %243 = vector.broadcast %cst_115 : f32 to vector<4x64xf32>
    %244 = arith.mulf %243, %216 : vector<4x64xf32>
    %245 = arith.addf %242, %244 : vector<4x64xf32>
    %cst_116 = arith.constant 0.000000e+00 : f32
    %246 = vector.broadcast %cst_116 : f32 to vector<4x64xf32>
    %247 = arith.maximumf %245, %246 : vector<4x64xf32>
    %c0_117 = arith.constant 0 : index
    %c1728 = arith.constant 1728 : index
    %248 = vector.load %arg5[%c0_117, %c1728] : memref<4x2048xf32, #tpu.memory_space<vmem>>, vector<4x64xf32>
    tpu.vector_store %arg5[%c0_117, %c1728], %247 {strides = array<i32>} : memref<4x2048xf32, #tpu.memory_space<vmem>>, vector<4x64xf32>,
    %249 = vector.extract_strided_slice %3 {offsets = [28, 0], sizes = [4, 64], strides = [1, 1]} : vector<40x64xf32> to vector<4x64xf32>
    %250 = vector.extract_strided_slice %3 {offsets = [32, 0], sizes = [4, 64], strides = [1, 1]} : vector<40x64xf32> to vector<4x64xf32>
    %251 = vector.extract_strided_slice %3 {offsets = [36, 0], sizes = [4, 64], strides = [1, 1]} : vector<40x64xf32> to vector<4x64xf32>
    %cst_118 = arith.constant 3.750000e-01 : f32
    %252 = vector.broadcast %cst_118 : f32 to vector<4x64xf32>
    %253 = arith.mulf %252, %249 : vector<4x64xf32>
    %cst_119 = arith.constant 6.250000e-01 : f32
    %254 = vector.broadcast %cst_119 : f32 to vector<4x64xf32>
    %255 = arith.mulf %254, %250 : vector<4x64xf32>
    %256 = arith.addf %253, %255 : vector<4x64xf32>
    %cst_120 = arith.constant 0.000000e+00 : f32
    %257 = vector.broadcast %cst_120 : f32 to vector<4x64xf32>
    %258 = arith.maximumf %256, %257 : vector<4x64xf32>
    %c0_121 = arith.constant 0 : index
    %c1792 = arith.constant 1792 : index
    %259 = vector.load %arg5[%c0_121, %c1792] : memref<4x2048xf32, #tpu.memory_space<vmem>>, vector<4x64xf32>
    tpu.vector_store %arg5[%c0_121, %c1792], %258 {strides = array<i32>} : memref<4x2048xf32, #tpu.memory_space<vmem>>, vector<4x64xf32>,
    %cst_122 = arith.constant 1.250000e-01 : f32
    %260 = vector.broadcast %cst_122 : f32 to vector<4x64xf32>
    %261 = arith.mulf %260, %249 : vector<4x64xf32>
    %cst_123 = arith.constant 8.750000e-01 : f32
    %262 = vector.broadcast %cst_123 : f32 to vector<4x64xf32>
    %263 = arith.mulf %262, %250 : vector<4x64xf32>
    %264 = arith.addf %261, %263 : vector<4x64xf32>
    %cst_124 = arith.constant 0.000000e+00 : f32
    %265 = vector.broadcast %cst_124 : f32 to vector<4x64xf32>
    %266 = arith.maximumf %264, %265 : vector<4x64xf32>
    %c0_125 = arith.constant 0 : index
    %c1856 = arith.constant 1856 : index
    %267 = vector.load %arg5[%c0_125, %c1856] : memref<4x2048xf32, #tpu.memory_space<vmem>>, vector<4x64xf32>
    tpu.vector_store %arg5[%c0_125, %c1856], %266 {strides = array<i32>} : memref<4x2048xf32, #tpu.memory_space<vmem>>, vector<4x64xf32>,
    %cst_126 = arith.constant 8.750000e-01 : f32
    %268 = vector.broadcast %cst_126 : f32 to vector<4x64xf32>
    %269 = arith.mulf %268, %250 : vector<4x64xf32>
    %cst_127 = arith.constant 1.250000e-01 : f32
    %270 = vector.broadcast %cst_127 : f32 to vector<4x64xf32>
    %271 = arith.mulf %270, %251 : vector<4x64xf32>
    %272 = arith.addf %269, %271 : vector<4x64xf32>
    %cst_128 = arith.constant 0.000000e+00 : f32
    %273 = vector.broadcast %cst_128 : f32 to vector<4x64xf32>
    %274 = arith.maximumf %272, %273 : vector<4x64xf32>
    %c0_129 = arith.constant 0 : index
    %c1920 = arith.constant 1920 : index
    %275 = vector.load %arg5[%c0_129, %c1920] : memref<4x2048xf32, #tpu.memory_space<vmem>>, vector<4x64xf32>
    tpu.vector_store %arg5[%c0_129, %c1920], %274 {strides = array<i32>} : memref<4x2048xf32, #tpu.memory_space<vmem>>, vector<4x64xf32>,
    %cst_130 = arith.constant 6.250000e-01 : f32
    %276 = vector.broadcast %cst_130 : f32 to vector<4x64xf32>
    %277 = arith.mulf %276, %250 : vector<4x64xf32>
    %cst_131 = arith.constant 3.750000e-01 : f32
    %278 = vector.broadcast %cst_131 : f32 to vector<4x64xf32>
    %279 = arith.mulf %278, %251 : vector<4x64xf32>
    %280 = arith.addf %277, %279 : vector<4x64xf32>
    %cst_132 = arith.constant 0.000000e+00 : f32
    %281 = vector.broadcast %cst_132 : f32 to vector<4x64xf32>
    %282 = arith.maximumf %280, %281 : vector<4x64xf32>
    %c0_133 = arith.constant 0 : index
    %c1984 = arith.constant 1984 : index
    %283 = vector.load %arg5[%c0_133, %c1984] : memref<4x2048xf32, #tpu.memory_space<vmem>>, vector<4x64xf32>
    tpu.vector_store %arg5[%c0_133, %c1984], %282 {strides = array<i32>} : memref<4x2048xf32, #tpu.memory_space<vmem>>, vector<4x64xf32>,
    %c0_134 = arith.constant 0 : index
    %c0_135 = arith.constant 0 : index
    %284 = vector.load %arg5[%c0_134, %c0_135] : memref<4x2048xf32, #tpu.memory_space<vmem>>, vector<4x2048xf32>
    %cst_136 = arith.constant dense<0.000000e+00> : vector<4xf32>
    %285 = vector.multi_reduction <add>, %284, %cst_136 [1] : vector<4x2048xf32> to vector<4xf32>
    %286 = vector.shape_cast %285 : vector<4xf32> to vector<4x1xf32>
    %c0_137 = arith.constant 0 : index
    %c0_138 = arith.constant 0 : index
    %c0_139 = arith.constant 0 : index
    %c0_140 = arith.constant 0 : index
    %287 = vector.load %arg4[%c0_137, %c0_138, %c0_139, %c0_140] : memref<1x1x4x5xf32, #tpu.memory_space<vmem>>, vector<1x1x4x1xf32>
    %288 = vector.shape_cast %287 : vector<1x1x4x1xf32> to vector<4x1xf32>
    %289 = vector.shape_cast %286 : vector<4x1xf32> to vector<1x1x4x1xf32>
    tpu.vector_store %arg4[%c0_137, %c0_138, %c0_139, %c0_140], %289 {strides = array<i32>} : memref<1x1x4x5xf32, #tpu.memory_space<vmem>>, vector<1x1x4x1xf32>,
    %cst_141 = arith.constant dense<0.000000e+00> : vector<4x4xf32>
    %290 = tpu.matmul %284, %284, %cst_141 {dimension_numbers = #tpu.dot_dimension_numbers<[1], [1], [0], [0], [0, 0, 1, 0], [], []>} : vector<4x2048xf32>, vector<4x2048xf32>, vector<4x4xf32> -> vector<4x4xf32>
    %c0_142 = arith.constant 0 : index
    %c0_143 = arith.constant 0 : index
    %c0_144 = arith.constant 0 : index
    %c1 = arith.constant 1 : index
    %291 = vector.load %arg4[%c0_142, %c0_143, %c0_144, %c1] : memref<1x1x4x5xf32, #tpu.memory_space<vmem>>, vector<1x1x4x4xf32>
    %292 = vector.shape_cast %291 : vector<1x1x4x4xf32> to vector<4x4xf32>
    %293 = vector.shape_cast %290 : vector<4x4xf32> to vector<1x1x4x4xf32>
    tpu.vector_store %arg4[%c0_142, %c0_143, %c0_144, %c1], %293 {strides = array<i32>} : memref<1x1x4x5xf32, #tpu.memory_space<vmem>>, vector<1x1x4x4xf32>,
    return
  }
  func.func @transform_0(%arg0: i32, %arg1: i32) -> (i32, i32, i32, i32) {
    %c0_i32 = arith.constant 0 : i32
    %c0_i32_0 = arith.constant 0 : i32
    %c0_i32_1 = arith.constant 0 : i32
    return %arg0, %arg1, %c0_i32, %c0_i32_0 : i32, i32, i32, i32
  }
  func.func @transform_1(%arg0: i32, %arg1: i32) -> (i32, i32) {
    %c0_i32 = arith.constant 0 : i32
    %c0_i32_0 = arith.constant 0 : i32
    %c0_i32_1 = arith.constant 0 : i32
    return %c0_i32, %c0_i32_0 : i32, i32
  }
  func.func @transform_2(%arg0: i32, %arg1: i32) -> (i32, i32, i32, i32) {
    %c0_i32 = arith.constant 0 : i32
    %c0_i32_0 = arith.constant 0 : i32
    %c0_i32_1 = arith.constant 0 : i32
    return %arg0, %arg1, %c0_i32, %c0_i32_0 : i32, i32, i32, i32
  }
}

module attributes {stable_mosaic.version = 11 : i64} {
  func.func @main_kernel(%arg0: i32, %arg1: i32, %arg2: memref<1x1x40x16xf32, #tpu.memory_space<vmem>>, %arg3: memref<16x64xf32, #tpu.memory_space<vmem>>, %arg4: memref<8x4xbf16, #tpu.memory_space<vmem>>, %arg5: memref<8x1xf32, #tpu.memory_space<vmem>>, %arg6: memref<8x1xf32, #tpu.memory_space<vmem>>, %arg7: memref<1x8x2048xf32, #tpu.memory_space<vmem>>, %arg8: memref<4x2048xf32, #tpu.memory_space<vmem>>) attributes {dimension_semantics = [#tpu.dimension_semantics<parallel>, #tpu.dimension_semantics<parallel>], iteration_bounds = array<i64: 2, 2>, scalar_prefetch = 0 : i64, scratch_operands = 1 : i64, tpu.core_type = #tpu.core_type<tc>, window_params = [{transform_indices = @transform_0, window_bounds = array<i64: 1, 1, 40, 16>}, {pipeline_mode = #tpu.pipeline_mode<synchronous>, transform_indices = @transform_1, window_bounds = array<i64: 16, 64>}, {pipeline_mode = #tpu.pipeline_mode<synchronous>, transform_indices = @transform_2, window_bounds = array<i64: 8, 4>}, {pipeline_mode = #tpu.pipeline_mode<synchronous>, transform_indices = @transform_3, window_bounds = array<i64: 8, 1>}, {pipeline_mode = #tpu.pipeline_mode<synchronous>, transform_indices = @transform_4, window_bounds = array<i64: 8, 1>}, {transform_indices = @transform_5, window_bounds = array<i64: 1, 8, 2048>}]} {
    %c0 = arith.constant 0 : index
    %c0_0 = arith.constant 0 : index
    %c0_1 = arith.constant 0 : index
    %c0_2 = arith.constant 0 : index
    %0 = vector.load %arg2[%c0, %c0_0, %c0_1, %c0_2] : memref<1x1x40x16xf32, #tpu.memory_space<vmem>>, vector<1x1x40x16xf32>
    %1 = vector.shape_cast %0 : vector<1x1x40x16xf32> to vector<40x16xf32>
    %c0_3 = arith.constant 0 : index
    %c0_4 = arith.constant 0 : index
    %2 = vector.load %arg3[%c0_3, %c0_4] : memref<16x64xf32, #tpu.memory_space<vmem>>, vector<16x64xf32>
    %cst = arith.constant dense<0.000000e+00> : vector<40x64xf32>
    %3 = tpu.matmul %1, %2, %cst {dimension_numbers = #tpu.dot_dimension_numbers<[1], [0], [0], [1], [0, 0, 1, 1], [], []>} : vector<40x16xf32>, vector<16x64xf32>, vector<40x64xf32> -> vector<40x64xf32>
    %4 = vector.extract_strided_slice %3 {offsets = [0, 0], sizes = [4, 64], strides = [1, 1]} : vector<40x64xf32> to vector<4x64xf32>
    %5 = vector.extract_strided_slice %3 {offsets = [4, 0], sizes = [4, 64], strides = [1, 1]} : vector<40x64xf32> to vector<4x64xf32>
    %6 = vector.extract_strided_slice %3 {offsets = [8, 0], sizes = [4, 64], strides = [1, 1]} : vector<40x64xf32> to vector<4x64xf32>
    %cst_5 = arith.constant 3.750000e-01 : f32
    %7 = vector.broadcast %cst_5 : f32 to vector<4x64xf32>
    %8 = arith.mulf %7, %4 : vector<4x64xf32>
    %cst_6 = arith.constant 6.250000e-01 : f32
    %9 = vector.broadcast %cst_6 : f32 to vector<4x64xf32>
    %10 = arith.mulf %9, %5 : vector<4x64xf32>
    %11 = arith.addf %8, %10 : vector<4x64xf32>
    %cst_7 = arith.constant 0.000000e+00 : f32
    %12 = vector.broadcast %cst_7 : f32 to vector<4x64xf32>
    %13 = arith.maximumf %11, %12 : vector<4x64xf32>
    %c0_8 = arith.constant 0 : index
    %c0_9 = arith.constant 0 : index
    %14 = vector.load %arg8[%c0_8, %c0_9] : memref<4x2048xf32, #tpu.memory_space<vmem>>, vector<4x64xf32>
    tpu.vector_store %arg8[%c0_8, %c0_9], %13 {strides = array<i32>} : memref<4x2048xf32, #tpu.memory_space<vmem>>, vector<4x64xf32>,
    %cst_10 = arith.constant 1.250000e-01 : f32
    %15 = vector.broadcast %cst_10 : f32 to vector<4x64xf32>
    %16 = arith.mulf %15, %4 : vector<4x64xf32>
    %cst_11 = arith.constant 8.750000e-01 : f32
    %17 = vector.broadcast %cst_11 : f32 to vector<4x64xf32>
    %18 = arith.mulf %17, %5 : vector<4x64xf32>
    %19 = arith.addf %16, %18 : vector<4x64xf32>
    %cst_12 = arith.constant 0.000000e+00 : f32
    %20 = vector.broadcast %cst_12 : f32 to vector<4x64xf32>
    %21 = arith.maximumf %19, %20 : vector<4x64xf32>
    %c0_13 = arith.constant 0 : index
    %c64 = arith.constant 64 : index
    %22 = vector.load %arg8[%c0_13, %c64] : memref<4x2048xf32, #tpu.memory_space<vmem>>, vector<4x64xf32>
    tpu.vector_store %arg8[%c0_13, %c64], %21 {strides = array<i32>} : memref<4x2048xf32, #tpu.memory_space<vmem>>, vector<4x64xf32>,
    %cst_14 = arith.constant 8.750000e-01 : f32
    %23 = vector.broadcast %cst_14 : f32 to vector<4x64xf32>
    %24 = arith.mulf %23, %5 : vector<4x64xf32>
    %cst_15 = arith.constant 1.250000e-01 : f32
    %25 = vector.broadcast %cst_15 : f32 to vector<4x64xf32>
    %26 = arith.mulf %25, %6 : vector<4x64xf32>
    %27 = arith.addf %24, %26 : vector<4x64xf32>
    %cst_16 = arith.constant 0.000000e+00 : f32
    %28 = vector.broadcast %cst_16 : f32 to vector<4x64xf32>
    %29 = arith.maximumf %27, %28 : vector<4x64xf32>
    %c0_17 = arith.constant 0 : index
    %c128 = arith.constant 128 : index
    %30 = vector.load %arg8[%c0_17, %c128] : memref<4x2048xf32, #tpu.memory_space<vmem>>, vector<4x64xf32>
    tpu.vector_store %arg8[%c0_17, %c128], %29 {strides = array<i32>} : memref<4x2048xf32, #tpu.memory_space<vmem>>, vector<4x64xf32>,
    %cst_18 = arith.constant 6.250000e-01 : f32
    %31 = vector.broadcast %cst_18 : f32 to vector<4x64xf32>
    %32 = arith.mulf %31, %5 : vector<4x64xf32>
    %cst_19 = arith.constant 3.750000e-01 : f32
    %33 = vector.broadcast %cst_19 : f32 to vector<4x64xf32>
    %34 = arith.mulf %33, %6 : vector<4x64xf32>
    %35 = arith.addf %32, %34 : vector<4x64xf32>
    %cst_20 = arith.constant 0.000000e+00 : f32
    %36 = vector.broadcast %cst_20 : f32 to vector<4x64xf32>
    %37 = arith.maximumf %35, %36 : vector<4x64xf32>
    %c0_21 = arith.constant 0 : index
    %c192 = arith.constant 192 : index
    %38 = vector.load %arg8[%c0_21, %c192] : memref<4x2048xf32, #tpu.memory_space<vmem>>, vector<4x64xf32>
    tpu.vector_store %arg8[%c0_21, %c192], %37 {strides = array<i32>} : memref<4x2048xf32, #tpu.memory_space<vmem>>, vector<4x64xf32>,
    %39 = vector.extract_strided_slice %3 {offsets = [4, 0], sizes = [4, 64], strides = [1, 1]} : vector<40x64xf32> to vector<4x64xf32>
    %40 = vector.extract_strided_slice %3 {offsets = [8, 0], sizes = [4, 64], strides = [1, 1]} : vector<40x64xf32> to vector<4x64xf32>
    %41 = vector.extract_strided_slice %3 {offsets = [12, 0], sizes = [4, 64], strides = [1, 1]} : vector<40x64xf32> to vector<4x64xf32>
    %cst_22 = arith.constant 3.750000e-01 : f32
    %42 = vector.broadcast %cst_22 : f32 to vector<4x64xf32>
    %43 = arith.mulf %42, %39 : vector<4x64xf32>
    %cst_23 = arith.constant 6.250000e-01 : f32
    %44 = vector.broadcast %cst_23 : f32 to vector<4x64xf32>
    %45 = arith.mulf %44, %40 : vector<4x64xf32>
    %46 = arith.addf %43, %45 : vector<4x64xf32>
    %cst_24 = arith.constant 0.000000e+00 : f32
    %47 = vector.broadcast %cst_24 : f32 to vector<4x64xf32>
    %48 = arith.maximumf %46, %47 : vector<4x64xf32>
    %c0_25 = arith.constant 0 : index
    %c256 = arith.constant 256 : index
    %49 = vector.load %arg8[%c0_25, %c256] : memref<4x2048xf32, #tpu.memory_space<vmem>>, vector<4x64xf32>
    tpu.vector_store %arg8[%c0_25, %c256], %48 {strides = array<i32>} : memref<4x2048xf32, #tpu.memory_space<vmem>>, vector<4x64xf32>,
    %cst_26 = arith.constant 1.250000e-01 : f32
    %50 = vector.broadcast %cst_26 : f32 to vector<4x64xf32>
    %51 = arith.mulf %50, %39 : vector<4x64xf32>
    %cst_27 = arith.constant 8.750000e-01 : f32
    %52 = vector.broadcast %cst_27 : f32 to vector<4x64xf32>
    %53 = arith.mulf %52, %40 : vector<4x64xf32>
    %54 = arith.addf %51, %53 : vector<4x64xf32>
    %cst_28 = arith.constant 0.000000e+00 : f32
    %55 = vector.broadcast %cst_28 : f32 to vector<4x64xf32>
    %56 = arith.maximumf %54, %55 : vector<4x64xf32>
    %c0_29 = arith.constant 0 : index
    %c320 = arith.constant 320 : index
    %57 = vector.load %arg8[%c0_29, %c320] : memref<4x2048xf32, #tpu.memory_space<vmem>>, vector<4x64xf32>
    tpu.vector_store %arg8[%c0_29, %c320], %56 {strides = array<i32>} : memref<4x2048xf32, #tpu.memory_space<vmem>>, vector<4x64xf32>,
    %cst_30 = arith.constant 8.750000e-01 : f32
    %58 = vector.broadcast %cst_30 : f32 to vector<4x64xf32>
    %59 = arith.mulf %58, %40 : vector<4x64xf32>
    %cst_31 = arith.constant 1.250000e-01 : f32
    %60 = vector.broadcast %cst_31 : f32 to vector<4x64xf32>
    %61 = arith.mulf %60, %41 : vector<4x64xf32>
    %62 = arith.addf %59, %61 : vector<4x64xf32>
    %cst_32 = arith.constant 0.000000e+00 : f32
    %63 = vector.broadcast %cst_32 : f32 to vector<4x64xf32>
    %64 = arith.maximumf %62, %63 : vector<4x64xf32>
    %c0_33 = arith.constant 0 : index
    %c384 = arith.constant 384 : index
    %65 = vector.load %arg8[%c0_33, %c384] : memref<4x2048xf32, #tpu.memory_space<vmem>>, vector<4x64xf32>
    tpu.vector_store %arg8[%c0_33, %c384], %64 {strides = array<i32>} : memref<4x2048xf32, #tpu.memory_space<vmem>>, vector<4x64xf32>,
    %cst_34 = arith.constant 6.250000e-01 : f32
    %66 = vector.broadcast %cst_34 : f32 to vector<4x64xf32>
    %67 = arith.mulf %66, %40 : vector<4x64xf32>
    %cst_35 = arith.constant 3.750000e-01 : f32
    %68 = vector.broadcast %cst_35 : f32 to vector<4x64xf32>
    %69 = arith.mulf %68, %41 : vector<4x64xf32>
    %70 = arith.addf %67, %69 : vector<4x64xf32>
    %cst_36 = arith.constant 0.000000e+00 : f32
    %71 = vector.broadcast %cst_36 : f32 to vector<4x64xf32>
    %72 = arith.maximumf %70, %71 : vector<4x64xf32>
    %c0_37 = arith.constant 0 : index
    %c448 = arith.constant 448 : index
    %73 = vector.load %arg8[%c0_37, %c448] : memref<4x2048xf32, #tpu.memory_space<vmem>>, vector<4x64xf32>
    tpu.vector_store %arg8[%c0_37, %c448], %72 {strides = array<i32>} : memref<4x2048xf32, #tpu.memory_space<vmem>>, vector<4x64xf32>,
    %74 = vector.extract_strided_slice %3 {offsets = [8, 0], sizes = [4, 64], strides = [1, 1]} : vector<40x64xf32> to vector<4x64xf32>
    %75 = vector.extract_strided_slice %3 {offsets = [12, 0], sizes = [4, 64], strides = [1, 1]} : vector<40x64xf32> to vector<4x64xf32>
    %76 = vector.extract_strided_slice %3 {offsets = [16, 0], sizes = [4, 64], strides = [1, 1]} : vector<40x64xf32> to vector<4x64xf32>
    %cst_38 = arith.constant 3.750000e-01 : f32
    %77 = vector.broadcast %cst_38 : f32 to vector<4x64xf32>
    %78 = arith.mulf %77, %74 : vector<4x64xf32>
    %cst_39 = arith.constant 6.250000e-01 : f32
    %79 = vector.broadcast %cst_39 : f32 to vector<4x64xf32>
    %80 = arith.mulf %79, %75 : vector<4x64xf32>
    %81 = arith.addf %78, %80 : vector<4x64xf32>
    %cst_40 = arith.constant 0.000000e+00 : f32
    %82 = vector.broadcast %cst_40 : f32 to vector<4x64xf32>
    %83 = arith.maximumf %81, %82 : vector<4x64xf32>
    %c0_41 = arith.constant 0 : index
    %c512 = arith.constant 512 : index
    %84 = vector.load %arg8[%c0_41, %c512] : memref<4x2048xf32, #tpu.memory_space<vmem>>, vector<4x64xf32>
    tpu.vector_store %arg8[%c0_41, %c512], %83 {strides = array<i32>} : memref<4x2048xf32, #tpu.memory_space<vmem>>, vector<4x64xf32>,
    %cst_42 = arith.constant 1.250000e-01 : f32
    %85 = vector.broadcast %cst_42 : f32 to vector<4x64xf32>
    %86 = arith.mulf %85, %74 : vector<4x64xf32>
    %cst_43 = arith.constant 8.750000e-01 : f32
    %87 = vector.broadcast %cst_43 : f32 to vector<4x64xf32>
    %88 = arith.mulf %87, %75 : vector<4x64xf32>
    %89 = arith.addf %86, %88 : vector<4x64xf32>
    %cst_44 = arith.constant 0.000000e+00 : f32
    %90 = vector.broadcast %cst_44 : f32 to vector<4x64xf32>
    %91 = arith.maximumf %89, %90 : vector<4x64xf32>
    %c0_45 = arith.constant 0 : index
    %c576 = arith.constant 576 : index
    %92 = vector.load %arg8[%c0_45, %c576] : memref<4x2048xf32, #tpu.memory_space<vmem>>, vector<4x64xf32>
    tpu.vector_store %arg8[%c0_45, %c576], %91 {strides = array<i32>} : memref<4x2048xf32, #tpu.memory_space<vmem>>, vector<4x64xf32>,
    %cst_46 = arith.constant 8.750000e-01 : f32
    %93 = vector.broadcast %cst_46 : f32 to vector<4x64xf32>
    %94 = arith.mulf %93, %75 : vector<4x64xf32>
    %cst_47 = arith.constant 1.250000e-01 : f32
    %95 = vector.broadcast %cst_47 : f32 to vector<4x64xf32>
    %96 = arith.mulf %95, %76 : vector<4x64xf32>
    %97 = arith.addf %94, %96 : vector<4x64xf32>
    %cst_48 = arith.constant 0.000000e+00 : f32
    %98 = vector.broadcast %cst_48 : f32 to vector<4x64xf32>
    %99 = arith.maximumf %97, %98 : vector<4x64xf32>
    %c0_49 = arith.constant 0 : index
    %c640 = arith.constant 640 : index
    %100 = vector.load %arg8[%c0_49, %c640] : memref<4x2048xf32, #tpu.memory_space<vmem>>, vector<4x64xf32>
    tpu.vector_store %arg8[%c0_49, %c640], %99 {strides = array<i32>} : memref<4x2048xf32, #tpu.memory_space<vmem>>, vector<4x64xf32>,
    %cst_50 = arith.constant 6.250000e-01 : f32
    %101 = vector.broadcast %cst_50 : f32 to vector<4x64xf32>
    %102 = arith.mulf %101, %75 : vector<4x64xf32>
    %cst_51 = arith.constant 3.750000e-01 : f32
    %103 = vector.broadcast %cst_51 : f32 to vector<4x64xf32>
    %104 = arith.mulf %103, %76 : vector<4x64xf32>
    %105 = arith.addf %102, %104 : vector<4x64xf32>
    %cst_52 = arith.constant 0.000000e+00 : f32
    %106 = vector.broadcast %cst_52 : f32 to vector<4x64xf32>
    %107 = arith.maximumf %105, %106 : vector<4x64xf32>
    %c0_53 = arith.constant 0 : index
    %c704 = arith.constant 704 : index
    %108 = vector.load %arg8[%c0_53, %c704] : memref<4x2048xf32, #tpu.memory_space<vmem>>, vector<4x64xf32>
    tpu.vector_store %arg8[%c0_53, %c704], %107 {strides = array<i32>} : memref<4x2048xf32, #tpu.memory_space<vmem>>, vector<4x64xf32>,
    %109 = vector.extract_strided_slice %3 {offsets = [12, 0], sizes = [4, 64], strides = [1, 1]} : vector<40x64xf32> to vector<4x64xf32>
    %110 = vector.extract_strided_slice %3 {offsets = [16, 0], sizes = [4, 64], strides = [1, 1]} : vector<40x64xf32> to vector<4x64xf32>
    %111 = vector.extract_strided_slice %3 {offsets = [20, 0], sizes = [4, 64], strides = [1, 1]} : vector<40x64xf32> to vector<4x64xf32>
    %cst_54 = arith.constant 3.750000e-01 : f32
    %112 = vector.broadcast %cst_54 : f32 to vector<4x64xf32>
    %113 = arith.mulf %112, %109 : vector<4x64xf32>
    %cst_55 = arith.constant 6.250000e-01 : f32
    %114 = vector.broadcast %cst_55 : f32 to vector<4x64xf32>
    %115 = arith.mulf %114, %110 : vector<4x64xf32>
    %116 = arith.addf %113, %115 : vector<4x64xf32>
    %cst_56 = arith.constant 0.000000e+00 : f32
    %117 = vector.broadcast %cst_56 : f32 to vector<4x64xf32>
    %118 = arith.maximumf %116, %117 : vector<4x64xf32>
    %c0_57 = arith.constant 0 : index
    %c768 = arith.constant 768 : index
    %119 = vector.load %arg8[%c0_57, %c768] : memref<4x2048xf32, #tpu.memory_space<vmem>>, vector<4x64xf32>
    tpu.vector_store %arg8[%c0_57, %c768], %118 {strides = array<i32>} : memref<4x2048xf32, #tpu.memory_space<vmem>>, vector<4x64xf32>,
    %cst_58 = arith.constant 1.250000e-01 : f32
    %120 = vector.broadcast %cst_58 : f32 to vector<4x64xf32>
    %121 = arith.mulf %120, %109 : vector<4x64xf32>
    %cst_59 = arith.constant 8.750000e-01 : f32
    %122 = vector.broadcast %cst_59 : f32 to vector<4x64xf32>
    %123 = arith.mulf %122, %110 : vector<4x64xf32>
    %124 = arith.addf %121, %123 : vector<4x64xf32>
    %cst_60 = arith.constant 0.000000e+00 : f32
    %125 = vector.broadcast %cst_60 : f32 to vector<4x64xf32>
    %126 = arith.maximumf %124, %125 : vector<4x64xf32>
    %c0_61 = arith.constant 0 : index
    %c832 = arith.constant 832 : index
    %127 = vector.load %arg8[%c0_61, %c832] : memref<4x2048xf32, #tpu.memory_space<vmem>>, vector<4x64xf32>
    tpu.vector_store %arg8[%c0_61, %c832], %126 {strides = array<i32>} : memref<4x2048xf32, #tpu.memory_space<vmem>>, vector<4x64xf32>,
    %cst_62 = arith.constant 8.750000e-01 : f32
    %128 = vector.broadcast %cst_62 : f32 to vector<4x64xf32>
    %129 = arith.mulf %128, %110 : vector<4x64xf32>
    %cst_63 = arith.constant 1.250000e-01 : f32
    %130 = vector.broadcast %cst_63 : f32 to vector<4x64xf32>
    %131 = arith.mulf %130, %111 : vector<4x64xf32>
    %132 = arith.addf %129, %131 : vector<4x64xf32>
    %cst_64 = arith.constant 0.000000e+00 : f32
    %133 = vector.broadcast %cst_64 : f32 to vector<4x64xf32>
    %134 = arith.maximumf %132, %133 : vector<4x64xf32>
    %c0_65 = arith.constant 0 : index
    %c896 = arith.constant 896 : index
    %135 = vector.load %arg8[%c0_65, %c896] : memref<4x2048xf32, #tpu.memory_space<vmem>>, vector<4x64xf32>
    tpu.vector_store %arg8[%c0_65, %c896], %134 {strides = array<i32>} : memref<4x2048xf32, #tpu.memory_space<vmem>>, vector<4x64xf32>,
    %cst_66 = arith.constant 6.250000e-01 : f32
    %136 = vector.broadcast %cst_66 : f32 to vector<4x64xf32>
    %137 = arith.mulf %136, %110 : vector<4x64xf32>
    %cst_67 = arith.constant 3.750000e-01 : f32
    %138 = vector.broadcast %cst_67 : f32 to vector<4x64xf32>
    %139 = arith.mulf %138, %111 : vector<4x64xf32>
    %140 = arith.addf %137, %139 : vector<4x64xf32>
    %cst_68 = arith.constant 0.000000e+00 : f32
    %141 = vector.broadcast %cst_68 : f32 to vector<4x64xf32>
    %142 = arith.maximumf %140, %141 : vector<4x64xf32>
    %c0_69 = arith.constant 0 : index
    %c960 = arith.constant 960 : index
    %143 = vector.load %arg8[%c0_69, %c960] : memref<4x2048xf32, #tpu.memory_space<vmem>>, vector<4x64xf32>
    tpu.vector_store %arg8[%c0_69, %c960], %142 {strides = array<i32>} : memref<4x2048xf32, #tpu.memory_space<vmem>>, vector<4x64xf32>,
    %144 = vector.extract_strided_slice %3 {offsets = [16, 0], sizes = [4, 64], strides = [1, 1]} : vector<40x64xf32> to vector<4x64xf32>
    %145 = vector.extract_strided_slice %3 {offsets = [20, 0], sizes = [4, 64], strides = [1, 1]} : vector<40x64xf32> to vector<4x64xf32>
    %146 = vector.extract_strided_slice %3 {offsets = [24, 0], sizes = [4, 64], strides = [1, 1]} : vector<40x64xf32> to vector<4x64xf32>
    %cst_70 = arith.constant 3.750000e-01 : f32
    %147 = vector.broadcast %cst_70 : f32 to vector<4x64xf32>
    %148 = arith.mulf %147, %144 : vector<4x64xf32>
    %cst_71 = arith.constant 6.250000e-01 : f32
    %149 = vector.broadcast %cst_71 : f32 to vector<4x64xf32>
    %150 = arith.mulf %149, %145 : vector<4x64xf32>
    %151 = arith.addf %148, %150 : vector<4x64xf32>
    %cst_72 = arith.constant 0.000000e+00 : f32
    %152 = vector.broadcast %cst_72 : f32 to vector<4x64xf32>
    %153 = arith.maximumf %151, %152 : vector<4x64xf32>
    %c0_73 = arith.constant 0 : index
    %c1024 = arith.constant 1024 : index
    %154 = vector.load %arg8[%c0_73, %c1024] : memref<4x2048xf32, #tpu.memory_space<vmem>>, vector<4x64xf32>
    tpu.vector_store %arg8[%c0_73, %c1024], %153 {strides = array<i32>} : memref<4x2048xf32, #tpu.memory_space<vmem>>, vector<4x64xf32>,
    %cst_74 = arith.constant 1.250000e-01 : f32
    %155 = vector.broadcast %cst_74 : f32 to vector<4x64xf32>
    %156 = arith.mulf %155, %144 : vector<4x64xf32>
    %cst_75 = arith.constant 8.750000e-01 : f32
    %157 = vector.broadcast %cst_75 : f32 to vector<4x64xf32>
    %158 = arith.mulf %157, %145 : vector<4x64xf32>
    %159 = arith.addf %156, %158 : vector<4x64xf32>
    %cst_76 = arith.constant 0.000000e+00 : f32
    %160 = vector.broadcast %cst_76 : f32 to vector<4x64xf32>
    %161 = arith.maximumf %159, %160 : vector<4x64xf32>
    %c0_77 = arith.constant 0 : index
    %c1088 = arith.constant 1088 : index
    %162 = vector.load %arg8[%c0_77, %c1088] : memref<4x2048xf32, #tpu.memory_space<vmem>>, vector<4x64xf32>
    tpu.vector_store %arg8[%c0_77, %c1088], %161 {strides = array<i32>} : memref<4x2048xf32, #tpu.memory_space<vmem>>, vector<4x64xf32>,
    %cst_78 = arith.constant 8.750000e-01 : f32
    %163 = vector.broadcast %cst_78 : f32 to vector<4x64xf32>
    %164 = arith.mulf %163, %145 : vector<4x64xf32>
    %cst_79 = arith.constant 1.250000e-01 : f32
    %165 = vector.broadcast %cst_79 : f32 to vector<4x64xf32>
    %166 = arith.mulf %165, %146 : vector<4x64xf32>
    %167 = arith.addf %164, %166 : vector<4x64xf32>
    %cst_80 = arith.constant 0.000000e+00 : f32
    %168 = vector.broadcast %cst_80 : f32 to vector<4x64xf32>
    %169 = arith.maximumf %167, %168 : vector<4x64xf32>
    %c0_81 = arith.constant 0 : index
    %c1152 = arith.constant 1152 : index
    %170 = vector.load %arg8[%c0_81, %c1152] : memref<4x2048xf32, #tpu.memory_space<vmem>>, vector<4x64xf32>
    tpu.vector_store %arg8[%c0_81, %c1152], %169 {strides = array<i32>} : memref<4x2048xf32, #tpu.memory_space<vmem>>, vector<4x64xf32>,
    %cst_82 = arith.constant 6.250000e-01 : f32
    %171 = vector.broadcast %cst_82 : f32 to vector<4x64xf32>
    %172 = arith.mulf %171, %145 : vector<4x64xf32>
    %cst_83 = arith.constant 3.750000e-01 : f32
    %173 = vector.broadcast %cst_83 : f32 to vector<4x64xf32>
    %174 = arith.mulf %173, %146 : vector<4x64xf32>
    %175 = arith.addf %172, %174 : vector<4x64xf32>
    %cst_84 = arith.constant 0.000000e+00 : f32
    %176 = vector.broadcast %cst_84 : f32 to vector<4x64xf32>
    %177 = arith.maximumf %175, %176 : vector<4x64xf32>
    %c0_85 = arith.constant 0 : index
    %c1216 = arith.constant 1216 : index
    %178 = vector.load %arg8[%c0_85, %c1216] : memref<4x2048xf32, #tpu.memory_space<vmem>>, vector<4x64xf32>
    tpu.vector_store %arg8[%c0_85, %c1216], %177 {strides = array<i32>} : memref<4x2048xf32, #tpu.memory_space<vmem>>, vector<4x64xf32>,
    %179 = vector.extract_strided_slice %3 {offsets = [20, 0], sizes = [4, 64], strides = [1, 1]} : vector<40x64xf32> to vector<4x64xf32>
    %180 = vector.extract_strided_slice %3 {offsets = [24, 0], sizes = [4, 64], strides = [1, 1]} : vector<40x64xf32> to vector<4x64xf32>
    %181 = vector.extract_strided_slice %3 {offsets = [28, 0], sizes = [4, 64], strides = [1, 1]} : vector<40x64xf32> to vector<4x64xf32>
    %cst_86 = arith.constant 3.750000e-01 : f32
    %182 = vector.broadcast %cst_86 : f32 to vector<4x64xf32>
    %183 = arith.mulf %182, %179 : vector<4x64xf32>
    %cst_87 = arith.constant 6.250000e-01 : f32
    %184 = vector.broadcast %cst_87 : f32 to vector<4x64xf32>
    %185 = arith.mulf %184, %180 : vector<4x64xf32>
    %186 = arith.addf %183, %185 : vector<4x64xf32>
    %cst_88 = arith.constant 0.000000e+00 : f32
    %187 = vector.broadcast %cst_88 : f32 to vector<4x64xf32>
    %188 = arith.maximumf %186, %187 : vector<4x64xf32>
    %c0_89 = arith.constant 0 : index
    %c1280 = arith.constant 1280 : index
    %189 = vector.load %arg8[%c0_89, %c1280] : memref<4x2048xf32, #tpu.memory_space<vmem>>, vector<4x64xf32>
    tpu.vector_store %arg8[%c0_89, %c1280], %188 {strides = array<i32>} : memref<4x2048xf32, #tpu.memory_space<vmem>>, vector<4x64xf32>,
    %cst_90 = arith.constant 1.250000e-01 : f32
    %190 = vector.broadcast %cst_90 : f32 to vector<4x64xf32>
    %191 = arith.mulf %190, %179 : vector<4x64xf32>
    %cst_91 = arith.constant 8.750000e-01 : f32
    %192 = vector.broadcast %cst_91 : f32 to vector<4x64xf32>
    %193 = arith.mulf %192, %180 : vector<4x64xf32>
    %194 = arith.addf %191, %193 : vector<4x64xf32>
    %cst_92 = arith.constant 0.000000e+00 : f32
    %195 = vector.broadcast %cst_92 : f32 to vector<4x64xf32>
    %196 = arith.maximumf %194, %195 : vector<4x64xf32>
    %c0_93 = arith.constant 0 : index
    %c1344 = arith.constant 1344 : index
    %197 = vector.load %arg8[%c0_93, %c1344] : memref<4x2048xf32, #tpu.memory_space<vmem>>, vector<4x64xf32>
    tpu.vector_store %arg8[%c0_93, %c1344], %196 {strides = array<i32>} : memref<4x2048xf32, #tpu.memory_space<vmem>>, vector<4x64xf32>,
    %cst_94 = arith.constant 8.750000e-01 : f32
    %198 = vector.broadcast %cst_94 : f32 to vector<4x64xf32>
    %199 = arith.mulf %198, %180 : vector<4x64xf32>
    %cst_95 = arith.constant 1.250000e-01 : f32
    %200 = vector.broadcast %cst_95 : f32 to vector<4x64xf32>
    %201 = arith.mulf %200, %181 : vector<4x64xf32>
    %202 = arith.addf %199, %201 : vector<4x64xf32>
    %cst_96 = arith.constant 0.000000e+00 : f32
    %203 = vector.broadcast %cst_96 : f32 to vector<4x64xf32>
    %204 = arith.maximumf %202, %203 : vector<4x64xf32>
    %c0_97 = arith.constant 0 : index
    %c1408 = arith.constant 1408 : index
    %205 = vector.load %arg8[%c0_97, %c1408] : memref<4x2048xf32, #tpu.memory_space<vmem>>, vector<4x64xf32>
    tpu.vector_store %arg8[%c0_97, %c1408], %204 {strides = array<i32>} : memref<4x2048xf32, #tpu.memory_space<vmem>>, vector<4x64xf32>,
    %cst_98 = arith.constant 6.250000e-01 : f32
    %206 = vector.broadcast %cst_98 : f32 to vector<4x64xf32>
    %207 = arith.mulf %206, %180 : vector<4x64xf32>
    %cst_99 = arith.constant 3.750000e-01 : f32
    %208 = vector.broadcast %cst_99 : f32 to vector<4x64xf32>
    %209 = arith.mulf %208, %181 : vector<4x64xf32>
    %210 = arith.addf %207, %209 : vector<4x64xf32>
    %cst_100 = arith.constant 0.000000e+00 : f32
    %211 = vector.broadcast %cst_100 : f32 to vector<4x64xf32>
    %212 = arith.maximumf %210, %211 : vector<4x64xf32>
    %c0_101 = arith.constant 0 : index
    %c1472 = arith.constant 1472 : index
    %213 = vector.load %arg8[%c0_101, %c1472] : memref<4x2048xf32, #tpu.memory_space<vmem>>, vector<4x64xf32>
    tpu.vector_store %arg8[%c0_101, %c1472], %212 {strides = array<i32>} : memref<4x2048xf32, #tpu.memory_space<vmem>>, vector<4x64xf32>,
    %214 = vector.extract_strided_slice %3 {offsets = [24, 0], sizes = [4, 64], strides = [1, 1]} : vector<40x64xf32> to vector<4x64xf32>
    %215 = vector.extract_strided_slice %3 {offsets = [28, 0], sizes = [4, 64], strides = [1, 1]} : vector<40x64xf32> to vector<4x64xf32>
    %216 = vector.extract_strided_slice %3 {offsets = [32, 0], sizes = [4, 64], strides = [1, 1]} : vector<40x64xf32> to vector<4x64xf32>
    %cst_102 = arith.constant 3.750000e-01 : f32
    %217 = vector.broadcast %cst_102 : f32 to vector<4x64xf32>
    %218 = arith.mulf %217, %214 : vector<4x64xf32>
    %cst_103 = arith.constant 6.250000e-01 : f32
    %219 = vector.broadcast %cst_103 : f32 to vector<4x64xf32>
    %220 = arith.mulf %219, %215 : vector<4x64xf32>
    %221 = arith.addf %218, %220 : vector<4x64xf32>
    %cst_104 = arith.constant 0.000000e+00 : f32
    %222 = vector.broadcast %cst_104 : f32 to vector<4x64xf32>
    %223 = arith.maximumf %221, %222 : vector<4x64xf32>
    %c0_105 = arith.constant 0 : index
    %c1536 = arith.constant 1536 : index
    %224 = vector.load %arg8[%c0_105, %c1536] : memref<4x2048xf32, #tpu.memory_space<vmem>>, vector<4x64xf32>
    tpu.vector_store %arg8[%c0_105, %c1536], %223 {strides = array<i32>} : memref<4x2048xf32, #tpu.memory_space<vmem>>, vector<4x64xf32>,
    %cst_106 = arith.constant 1.250000e-01 : f32
    %225 = vector.broadcast %cst_106 : f32 to vector<4x64xf32>
    %226 = arith.mulf %225, %214 : vector<4x64xf32>
    %cst_107 = arith.constant 8.750000e-01 : f32
    %227 = vector.broadcast %cst_107 : f32 to vector<4x64xf32>
    %228 = arith.mulf %227, %215 : vector<4x64xf32>
    %229 = arith.addf %226, %228 : vector<4x64xf32>
    %cst_108 = arith.constant 0.000000e+00 : f32
    %230 = vector.broadcast %cst_108 : f32 to vector<4x64xf32>
    %231 = arith.maximumf %229, %230 : vector<4x64xf32>
    %c0_109 = arith.constant 0 : index
    %c1600 = arith.constant 1600 : index
    %232 = vector.load %arg8[%c0_109, %c1600] : memref<4x2048xf32, #tpu.memory_space<vmem>>, vector<4x64xf32>
    tpu.vector_store %arg8[%c0_109, %c1600], %231 {strides = array<i32>} : memref<4x2048xf32, #tpu.memory_space<vmem>>, vector<4x64xf32>,
    %cst_110 = arith.constant 8.750000e-01 : f32
    %233 = vector.broadcast %cst_110 : f32 to vector<4x64xf32>
    %234 = arith.mulf %233, %215 : vector<4x64xf32>
    %cst_111 = arith.constant 1.250000e-01 : f32
    %235 = vector.broadcast %cst_111 : f32 to vector<4x64xf32>
    %236 = arith.mulf %235, %216 : vector<4x64xf32>
    %237 = arith.addf %234, %236 : vector<4x64xf32>
    %cst_112 = arith.constant 0.000000e+00 : f32
    %238 = vector.broadcast %cst_112 : f32 to vector<4x64xf32>
    %239 = arith.maximumf %237, %238 : vector<4x64xf32>
    %c0_113 = arith.constant 0 : index
    %c1664 = arith.constant 1664 : index
    %240 = vector.load %arg8[%c0_113, %c1664] : memref<4x2048xf32, #tpu.memory_space<vmem>>, vector<4x64xf32>
    tpu.vector_store %arg8[%c0_113, %c1664], %239 {strides = array<i32>} : memref<4x2048xf32, #tpu.memory_space<vmem>>, vector<4x64xf32>,
    %cst_114 = arith.constant 6.250000e-01 : f32
    %241 = vector.broadcast %cst_114 : f32 to vector<4x64xf32>
    %242 = arith.mulf %241, %215 : vector<4x64xf32>
    %cst_115 = arith.constant 3.750000e-01 : f32
    %243 = vector.broadcast %cst_115 : f32 to vector<4x64xf32>
    %244 = arith.mulf %243, %216 : vector<4x64xf32>
    %245 = arith.addf %242, %244 : vector<4x64xf32>
    %cst_116 = arith.constant 0.000000e+00 : f32
    %246 = vector.broadcast %cst_116 : f32 to vector<4x64xf32>
    %247 = arith.maximumf %245, %246 : vector<4x64xf32>
    %c0_117 = arith.constant 0 : index
    %c1728 = arith.constant 1728 : index
    %248 = vector.load %arg8[%c0_117, %c1728] : memref<4x2048xf32, #tpu.memory_space<vmem>>, vector<4x64xf32>
    tpu.vector_store %arg8[%c0_117, %c1728], %247 {strides = array<i32>} : memref<4x2048xf32, #tpu.memory_space<vmem>>, vector<4x64xf32>,
    %249 = vector.extract_strided_slice %3 {offsets = [28, 0], sizes = [4, 64], strides = [1, 1]} : vector<40x64xf32> to vector<4x64xf32>
    %250 = vector.extract_strided_slice %3 {offsets = [32, 0], sizes = [4, 64], strides = [1, 1]} : vector<40x64xf32> to vector<4x64xf32>
    %251 = vector.extract_strided_slice %3 {offsets = [36, 0], sizes = [4, 64], strides = [1, 1]} : vector<40x64xf32> to vector<4x64xf32>
    %cst_118 = arith.constant 3.750000e-01 : f32
    %252 = vector.broadcast %cst_118 : f32 to vector<4x64xf32>
    %253 = arith.mulf %252, %249 : vector<4x64xf32>
    %cst_119 = arith.constant 6.250000e-01 : f32
    %254 = vector.broadcast %cst_119 : f32 to vector<4x64xf32>
    %255 = arith.mulf %254, %250 : vector<4x64xf32>
    %256 = arith.addf %253, %255 : vector<4x64xf32>
    %cst_120 = arith.constant 0.000000e+00 : f32
    %257 = vector.broadcast %cst_120 : f32 to vector<4x64xf32>
    %258 = arith.maximumf %256, %257 : vector<4x64xf32>
    %c0_121 = arith.constant 0 : index
    %c1792 = arith.constant 1792 : index
    %259 = vector.load %arg8[%c0_121, %c1792] : memref<4x2048xf32, #tpu.memory_space<vmem>>, vector<4x64xf32>
    tpu.vector_store %arg8[%c0_121, %c1792], %258 {strides = array<i32>} : memref<4x2048xf32, #tpu.memory_space<vmem>>, vector<4x64xf32>,
    %cst_122 = arith.constant 1.250000e-01 : f32
    %260 = vector.broadcast %cst_122 : f32 to vector<4x64xf32>
    %261 = arith.mulf %260, %249 : vector<4x64xf32>
    %cst_123 = arith.constant 8.750000e-01 : f32
    %262 = vector.broadcast %cst_123 : f32 to vector<4x64xf32>
    %263 = arith.mulf %262, %250 : vector<4x64xf32>
    %264 = arith.addf %261, %263 : vector<4x64xf32>
    %cst_124 = arith.constant 0.000000e+00 : f32
    %265 = vector.broadcast %cst_124 : f32 to vector<4x64xf32>
    %266 = arith.maximumf %264, %265 : vector<4x64xf32>
    %c0_125 = arith.constant 0 : index
    %c1856 = arith.constant 1856 : index
    %267 = vector.load %arg8[%c0_125, %c1856] : memref<4x2048xf32, #tpu.memory_space<vmem>>, vector<4x64xf32>
    tpu.vector_store %arg8[%c0_125, %c1856], %266 {strides = array<i32>} : memref<4x2048xf32, #tpu.memory_space<vmem>>, vector<4x64xf32>,
    %cst_126 = arith.constant 8.750000e-01 : f32
    %268 = vector.broadcast %cst_126 : f32 to vector<4x64xf32>
    %269 = arith.mulf %268, %250 : vector<4x64xf32>
    %cst_127 = arith.constant 1.250000e-01 : f32
    %270 = vector.broadcast %cst_127 : f32 to vector<4x64xf32>
    %271 = arith.mulf %270, %251 : vector<4x64xf32>
    %272 = arith.addf %269, %271 : vector<4x64xf32>
    %cst_128 = arith.constant 0.000000e+00 : f32
    %273 = vector.broadcast %cst_128 : f32 to vector<4x64xf32>
    %274 = arith.maximumf %272, %273 : vector<4x64xf32>
    %c0_129 = arith.constant 0 : index
    %c1920 = arith.constant 1920 : index
    %275 = vector.load %arg8[%c0_129, %c1920] : memref<4x2048xf32, #tpu.memory_space<vmem>>, vector<4x64xf32>
    tpu.vector_store %arg8[%c0_129, %c1920], %274 {strides = array<i32>} : memref<4x2048xf32, #tpu.memory_space<vmem>>, vector<4x64xf32>,
    %cst_130 = arith.constant 6.250000e-01 : f32
    %276 = vector.broadcast %cst_130 : f32 to vector<4x64xf32>
    %277 = arith.mulf %276, %250 : vector<4x64xf32>
    %cst_131 = arith.constant 3.750000e-01 : f32
    %278 = vector.broadcast %cst_131 : f32 to vector<4x64xf32>
    %279 = arith.mulf %278, %251 : vector<4x64xf32>
    %280 = arith.addf %277, %279 : vector<4x64xf32>
    %cst_132 = arith.constant 0.000000e+00 : f32
    %281 = vector.broadcast %cst_132 : f32 to vector<4x64xf32>
    %282 = arith.maximumf %280, %281 : vector<4x64xf32>
    %c0_133 = arith.constant 0 : index
    %c1984 = arith.constant 1984 : index
    %283 = vector.load %arg8[%c0_133, %c1984] : memref<4x2048xf32, #tpu.memory_space<vmem>>, vector<4x64xf32>
    tpu.vector_store %arg8[%c0_133, %c1984], %282 {strides = array<i32>} : memref<4x2048xf32, #tpu.memory_space<vmem>>, vector<4x64xf32>,
    %c0_134 = arith.constant 0 : index
    %c0_135 = arith.constant 0 : index
    %284 = vector.load %arg4[%c0_134, %c0_135] : memref<8x4xbf16, #tpu.memory_space<vmem>>, vector<8x4xbf16>
    %c0_136 = arith.constant 0 : index
    %c0_137 = arith.constant 0 : index
    %285 = vector.load %arg8[%c0_136, %c0_137] : memref<4x2048xf32, #tpu.memory_space<vmem>>, vector<4x2048xf32>
    %286 = arith.truncf %285 : vector<4x2048xf32> to vector<4x2048xbf16>
    %cst_138 = arith.constant dense<0.000000e+00> : vector<8x2048xf32>
    %287 = tpu.matmul %284, %286, %cst_138 {dimension_numbers = #tpu.dot_dimension_numbers<[1], [0], [0], [1], [0, 0, 1, 1], [], []>} : vector<8x4xbf16>, vector<4x2048xbf16>, vector<8x2048xf32> -> vector<8x2048xf32>
    %c0_139 = arith.constant 0 : index
    %c0_140 = arith.constant 0 : index
    %288 = vector.load %arg5[%c0_139, %c0_140] : memref<8x1xf32, #tpu.memory_space<vmem>>, vector<8x1xf32>
    %289 = vector.broadcast %288 : vector<8x1xf32> to vector<8x2048xf32>
    %290 = arith.mulf %287, %289 : vector<8x2048xf32>
    %c0_141 = arith.constant 0 : index
    %c0_142 = arith.constant 0 : index
    %291 = vector.load %arg6[%c0_141, %c0_142] : memref<8x1xf32, #tpu.memory_space<vmem>>, vector<8x1xf32>
    %292 = vector.broadcast %291 : vector<8x1xf32> to vector<8x2048xf32>
    %293 = arith.addf %290, %292 : vector<8x2048xf32>
    %c0_143 = arith.constant 0 : index
    %c0_144 = arith.constant 0 : index
    %c0_145 = arith.constant 0 : index
    %294 = vector.load %arg7[%c0_143, %c0_144, %c0_145] : memref<1x8x2048xf32, #tpu.memory_space<vmem>>, vector<1x8x2048xf32>
    %295 = vector.shape_cast %294 : vector<1x8x2048xf32> to vector<8x2048xf32>
    %296 = vector.shape_cast %293 : vector<8x2048xf32> to vector<1x8x2048xf32>
    tpu.vector_store %arg7[%c0_143, %c0_144, %c0_145], %296 {strides = array<i32>} : memref<1x8x2048xf32, #tpu.memory_space<vmem>>, vector<1x8x2048xf32>,
    return
  }
  func.func @transform_0(%arg0: i32, %arg1: i32) -> (i32, i32, i32, i32) {
    %c0_i32 = arith.constant 0 : i32
    %c0_i32_0 = arith.constant 0 : i32
    %c0_i32_1 = arith.constant 0 : i32
    return %arg0, %arg1, %c0_i32, %c0_i32_0 : i32, i32, i32, i32
  }
  func.func @transform_1(%arg0: i32, %arg1: i32) -> (i32, i32) {
    %c0_i32 = arith.constant 0 : i32
    %c0_i32_0 = arith.constant 0 : i32
    %c0_i32_1 = arith.constant 0 : i32
    return %c0_i32, %c0_i32_0 : i32, i32
  }
  func.func @transform_2(%arg0: i32, %arg1: i32) -> (i32, i32) {
    %c0_i32 = arith.constant 0 : i32
    %c0_i32_0 = arith.constant 0 : i32
    %c0_i32_1 = arith.constant 0 : i32
    return %c0_i32, %c0_i32_0 : i32, i32
  }
  func.func @transform_3(%arg0: i32, %arg1: i32) -> (i32, i32) {
    %c0_i32 = arith.constant 0 : i32
    %c0_i32_0 = arith.constant 0 : i32
    %c0_i32_1 = arith.constant 0 : i32
    return %c0_i32, %c0_i32_0 : i32, i32
  }
  func.func @transform_4(%arg0: i32, %arg1: i32) -> (i32, i32) {
    %c0_i32 = arith.constant 0 : i32
    %c0_i32_0 = arith.constant 0 : i32
    %c0_i32_1 = arith.constant 0 : i32
    return %c0_i32, %c0_i32_0 : i32, i32
  }
  func.func @transform_5(%arg0: i32, %arg1: i32) -> (i32, i32, i32) {
    %c0_i32 = arith.constant 0 : i32
    %c0_i32_0 = arith.constant 0 : i32
    return %arg0, %c0_i32, %arg1 : i32, i32, i32
  }
}

</mosaic_0001>

<bundles_post_ra>
// kernel: mul.2
= control target key start
LH: loop header
LB: loop body
LE: loop exit
PB: predicated region body
PF: predicated region fallthrough
CT: control target
= control target key end

     0   :  { %s34_s0 = inlined_call_operand.vmem [shape: f32[8,1], index: 0, kind: input, shape index: {}]   ;;  %s35_s1 = inlined_call_operand.vmem [shape: f32[8,1], index: 1, kind: input, shape index: {}]   ;;  %s36_s2 = inlined_call_operand.vmem [shape: f32[8,1], index: 2, kind: output, shape index: {}]  }
   0x1   :  { %v3_v0 = vld [vmem:[%s34_s0] sm:$0xff] }
   0x2   :  { %v4_v1 = vld [vmem:[%s35_s1] sm:$0xff] }
   0x3   :  { %v7_v2 = vmul.f32 %v4_v1, %v3_v0 }
   0x5   :  { %9 = vst [vmem:[%s36_s2] sm:$0xff] %v7_v2 }

// kernel: double_factorized_increase.3
= control target key start
LH: loop header
LB: loop body
LE: loop exit
PB: predicated region body
PF: predicated region fallthrough
CT: control target
= control target key end

     0   :  { %s1259_s18 = smov 0   ;;  %s1261_s19 = smov 0   ;;  %s1541_s0 = inlined_call_operand.vmem [shape: f32[2,2,40,16], index: 0, kind: input, shape index: {}]   ;;  %s1542_s1 = inlined_call_operand.vmem [shape: f32[16,64], index: 1, kind: input, shape index: {}]   ;;  %s1543_s2 = inlined_call_operand.vmem [shape: bf16[8,4], index: 2, kind: input, shape index: {}]   ;;  %s1544_s3 = inlined_call_operand.vmem [shape: f32[8,1], index: 3, kind: input, shape index: {}]   ;;  %s1545_s4 = inlined_call_operand.vmem [shape: f32[8,1], index: 4, kind: input, shape index: {}]   ;;  %s1546_s5 = inlined_call_operand.vmem [shape: f32[2,8,4096], index: 5, kind: output, shape index: {}]  }
   0x1   :  { %s1263_s20 = smov 0   ;;  %s1265_s21 = smov 0  }
   0x2   :  { %s1267_s22 = smov 0  }
   0x3 LB: > { %s24_s23 = sadd.s32 1, %s1217_s20  ;;  %s27_s24 = sadd.s32 1, %s1221_s21  ;;  %s1225_s22 = sphi %s1267_s22, %s15_s22   ;;  %s1221_s21 = sphi %s1265_s21, %s1550_s21   ;;  %s1217_s20 = sphi %s1263_s20, %s1549_s20   ;;  %s1213_s19 = sphi %s1261_s19, %s1548_s19   ;;  %s1209_s18 = sphi %s1259_s18, %s1547_s18  }
   0x4   : > { %p25_p0 = scmp.ge.s32.totalorder %s24_s23, 2  ;;  %p1112_p1 = scmp.ge.s32.totalorder %s1225_s22, 1 }
   0x5   : > { %p207_p2 = scmp.lt.s32.totalorder %s1225_s22, 5 }
   0x6   : > { %s1552_s23 = smov (%p25_p0, %s24_s23), 0  ;;  %s1554_s24 = smov (!%p25_p0, %s27_s24), %s1221_s21 }
   0x7   : > { %p208_p3 = pnand %p1112_p1, %p207_p2  ;;  %p29_p4 = scmp.ge.s32.totalorder %s1554_s24, 2 }
   0x8   : > { %p243_p5 = scmp.lt.s32.totalorder (!%p208_p3), %s1213_s19, 1  ;;  %p245_p6 = scmp.lt.s32.totalorder (!%p208_p3), %s1209_s18, 1 }
   0x9   : > { %s1556_s24 = smov (%p29_p4, %s1554_s24), 0  ;;  %211 = sbr.rel (%p208_p3) target bundleno = 555 (0x22b), region = 40 }
   0xa   : > { %s1227_s12 = smov (!%p208_p3), 64   ;;  %s1114_s26 = sshll.u32 (!%p208_p3), %s1209_s18, 4 }
   0xb   : > { %p255_p7 = scmp.lt.s32.totalorder (!%p208_p3), %s1114_s26, 31 }
   0xe   : > { %v269_v0 = vld [vmem:[%s1542_s1 + $0x8] sm:$0xff]  ;;  %v268_v1 = vld [vmem:[%s1542_s1] sm:$0xff]  ;;  %s1558_s19 = smov (!%p243_p5, %s1213_s19), 1  ;;  %vm270_vm0 = vcmask 130048   ;;  %vm325_vm1 = vcmask 519168   ;;  %vm338_vm2 = vcmask 1043968  }
   0xf   : > { %300 = vmatpush.msra.mxu0 %v269_v0  ;;  %s246_s29 = scalar_select %p245_p6, %s1209_s18, 1  ;;  %vm698_vm3 = vcmask 1041408   ;;  %vm694_vm4 = vcmask 31744  }
  0x10   : > { %s1141_s30 = smul.u32 10, %s1558_s19  ;;  %s1560_s26 = smov (!%p255_p7, %s1114_s26), 31 }
  0x11   : > { %301 = vmatpush.msra.mxu0 %v268_v1  ;;  %s1140_s6 = smul.u32 5, %s246_s29  ;;  %s1115_s27 = sshll.u32 %s1558_s19, 5 }
  0x12   : > { %s258_s28 = sadd.s32 %s1115_s27, %s1560_s26 }
  0x13   : > { %s249_s7 = sadd.s32 %s1141_s30, %s1140_s6  ;;  %s1116_s29 = sshll.u32 %s258_s28, 3 }
  0x14   : > { %s1113_s8 = sshll.u32 %s249_s7, 3  ;;  %s1476_s7 = scalar_lea.vmem %s1546_s5, %s1116_s29 }
  0x15   : > { %s251_s11 = scalar_lea.vmem %s1541_s0, %s1113_s8 }
  0x16   : > { %v263_v2 = vld [vmem:[%s251_s11] sm:$0xff]  ;;  %v264_v3 = vld [vmem:[%s251_s11 + $0x8] sm:$0xff]  ;;  %v265_v4 = vld [vmem:[%s251_s11 + $0x10] sm:$0xff] }
  0x17   : > { %1117 = vmatmul.msk.f32.vlgmr.msra.gmra.mxu0 %vm270_vm0, %v263_v2  ;;  %v266_v5 = vld [vmem:[%s251_s11 + $0x18] sm:$0xff]  ;;  %v267_v6 = vld [vmem:[%s251_s11 + $0x20] sm:$0xff] }
  0x1f   : > { %1118 = vmatmul.msk.f32.gmra.mxu0 %vm270_vm0, %v264_v3 }
  0x27   : > { %1119 = vmatmul.msk.f32.gmra.mxu0 %vm270_vm0, %v265_v4 }
  0x2f   : > { %1120 = vmatmul.msk.f32.gmra.mxu0 %vm270_vm0, %v266_v5 }
  0x37   : > { %1121 = vmatmul.msk.f32.gmra.mxu0 %vm270_vm0, %v267_v6 }
  0x94   : > { %v303_v7 = vpop.f32.mrf.mxu0 }
  0x95   : > { %v319_v8 = vmul.f32 0.625, %v303_v7  ;;  %v328_v9 = vmul.f32 0.875, %v303_v7  ;;  %v318_v10 = vmul.f32 0.375, %v303_v7  ;;  %v327_v12 = vmul.f32 0.125, %v303_v7 }
  0x97   : > { %v321_v11 = vrot.slane %v319_v8, 4  ;;  %v330_v13 = vrot.slane %v328_v9, 4 }
  0x99   : > { %v332_v14 = vadd.f32 %v330_v13, %v327_v12  ;;  %v323_v15 = vadd.f32 %v321_v11, %v318_v10 }
  0x9b   : > { %v333_v16 = vmax.f32 %v332_v14, 0.0  ;;  %v324_v17 = vmax.f32 %v323_v15, 0.0 }
  0x9c   : > { %v306_v18 = vpop.f32.mrf.mxu0 }
  0x9d   : > { %v1305_v19 = vmul.f32 0.125, %v306_v18  ;;  %v1307_v20 = vmul.f32 0.625, %v306_v18  ;;  %v378_v21 = vmul.f32 0.875, %v306_v18  ;;  %335 = vrot.lane.b32.xlu0 %v333_v16, %s1227_s12  ;;  %326 = vst.msk [vmem:[#allocation2] sm:$0xf] %vm325_vm1, %v324_v17  ;;  %v1312_v23 = vmul.f32 0.375, %v306_v18 }
  0x9f   : > { %v342_v22 = vrot.slane %v1305_v19, 4  ;;  %v368_v24 = vrot.slane %v1307_v20, 4  ;;  %v380_v25 = vrot.slane %v378_v21, 4  ;;  %v354_v31 = vrot.slane %v1312_v23, 4 }
  0xa1   : > { %v344_v26 = vadd.f32 %v342_v22, %v328_v9  ;;  %v405_v27 = vadd.f32 %v380_v25, %v1305_v19  ;;  %v402_v28 = vadd.f32 %v368_v24, %v1312_v23  ;;  %v392_v29 = vadd.f32 %v378_v21, %v342_v22 }
  0xa2   : > { %v356_v38 = vadd.f32 %v354_v31, %v319_v8  ;;  %v370_v49 = vadd.f32 %v368_v24, %v318_v10  ;;  %v382_v52 = vadd.f32 %v380_v25, %v327_v12  ;;  %v395_v6 = vadd.f32 %v1307_v20, %v354_v31 }
  0xa3   : > { %v345_v30 = vmax.f32 %v344_v26, 0.0  ;;  %v406_v33 = vmax.f32 %v405_v27, 0.0  ;;  %v403_v34 = vmax.f32 %v402_v28, 0.0  ;;  %v393_v35 = vmax.f32 %v392_v29, 0.0 }
  0xa4   : > { %v309_v32 = vpop.f32.mrf.mxu0  ;;  %v357_v45 = vmax.f32 %v356_v38, 0.0  ;;  %v371_v50 = vmax.f32 %v370_v49, 0.0  ;;  %v383_v54 = vmax.f32 %v382_v52, 0.0  ;;  %v396_v8 = vmax.f32 %v395_v6, 0.0 }
  0xa5   : > { %347 = vst.sshfl [vmem:[#allocation1] sm:$0xff pattern:$0x75316420] %v345_v30  ;;  %v1318_v36 = vmul.f32 0.125, %v309_v32  ;;  %v1320_v37 = vmul.f32 0.625, %v309_v32  ;;  %408 = vrot.lane.b32.xlu2 %v406_v33, %s1227_s12  ;;  %v1326_v40 = vmul.f32 0.375, %v309_v32 }
  0xa6   : > { %404 = vst.msk [vmem:[#allocation2 + $0x10] sm:$0xf] %vm325_vm1, %v403_v34  ;;  %v1329_v42 = vmul.f32 0.875, %v309_v32 }
  0xa7   : > { %394 = vst.msk [vmem:[#allocation2 + $0xc] sm:$0xf] %vm325_vm1, %v393_v35  ;;  %v414_v39 = vrot.slane %v1318_v36, 4  ;;  %v440_v41 = vrot.slane %v1320_v37, 4  ;;  %v426_v2 = vrot.slane %v1326_v40, 4 }
  0xa8   : > { %v452_v15 = vrot.slane %v1329_v42, 4 }
  0xa9   : > { %v474_v43 = vadd.f32 %v440_v41, %v1326_v40  ;;  %v464_v44 = vadd.f32 %v1329_v42, %v414_v39  ;;  %v416_v58 = vadd.f32 %v414_v39, %v378_v21  ;;  %v428_v7 = vadd.f32 %v426_v2, %v1307_v20 }
  0xaa   : > { %v442_v11 = vadd.f32 %v440_v41, %v1312_v23  ;;  %v467_v12 = vadd.f32 %v1320_v37, %v426_v2  ;;  %v454_v17 = vadd.f32 %v452_v15, %v1305_v19  ;;  %v477_v18 = vadd.f32 %v452_v15, %v1318_v36 }
  0xab   : > { %v475_v47 = vmax.f32 %v474_v43, 0.0  ;;  %v465_v48 = vmax.f32 %v464_v44, 0.0  ;;  %v417_v1 = vmax.f32 %v416_v58, 0.0  ;;  %v429_v9 = vmax.f32 %v428_v7, 0.0 }
  0xac   : > { %v349_v46 = vld [vmem:[#allocation1 + $0x1] ss:$2 sm:$0xff]  ;;  %v312_v53 = vpop.f32.mrf.mxu0  ;;  %v443_v13 = vmax.f32 %v442_v11, 0.0  ;;  %v468_v14 = vmax.f32 %v467_v12, 0.0  ;;  %v455_v22 = vmax.f32 %v454_v17, 0.0  ;;  %v478_v23 = vmax.f32 %v477_v18, 0.0 }
  0xad   : > { %359 = vst.sshfl [vmem:[#allocation1] sm:$0xff pattern:$0x75316420] %v357_v45  ;;  %v1337_v55 = vmul.f32 0.125, %v312_v53  ;;  %v1339_v56 = vmul.f32 0.625, %v312_v53  ;;  %v1343_v60 = vmul.f32 0.375, %v312_v53 }
  0xae   : > { %351 = vst.msk [vmem:[#allocation2 + $0x4] sm:$0xf] %vm325_vm1, %v349_v46  ;;  %v1346_v62 = vmul.f32 0.875, %v312_v53 }
  0xaf   : > { %476 = vst.msk [vmem:[#allocation2 + $0x20] sm:$0xf] %vm325_vm1, %v475_v47  ;;  %v486_v59 = vrot.slane %v1337_v55, 4  ;;  %v512_v61 = vrot.slane %v1339_v56, 4  ;;  %v498_v25 = vrot.slane %v1343_v60, 4 }
  0xb0   : > { %466 = vst.msk [vmem:[#allocation2 + $0x1c] sm:$0xf] %vm325_vm1, %v465_v48 }
  0xb1   : > { %v536_v63 = vadd.f32 %v1346_v62, %v486_v59  ;;  %v546_v0 = vadd.f32 %v512_v61, %v1343_v60  ;;  %v488_v26 = vadd.f32 %v486_v59, %v1329_v42  ;;  %v539_v19 = vadd.f32 %v1339_v56, %v498_v25 }
  0xb2   : > { %v500_v34 = vadd.f32 %v498_v25, %v1320_v37  ;;  %v514_v39 = vadd.f32 %v512_v61, %v1326_v40  ;;  %v524_v42 = vrot.slane %v1346_v62, 4 }
  0xb3   : > { %v537_v3 = vmax.f32 %v536_v63, 0.0  ;;  %v547_v4 = vmax.f32 %v546_v0, 0.0  ;;  %v489_v30 = vmax.f32 %v488_v26, 0.0  ;;  %v540_v31 = vmax.f32 %v539_v19, 0.0 }
  0xb4   : > { %v361_v51 = vld [vmem:[#allocation1 + $0x1] ss:$2 sm:$0xff]  ;;  %v315_v20 = vpop.f32.mrf.mxu0  ;;  %v501_v35 = vmax.f32 %v500_v34, 0.0  ;;  %v515_v41 = vmax.f32 %v514_v39, 0.0  ;;  %v526_v44 = vadd.f32 %v524_v42, %v1318_v36  ;;  %v549_v45 = vadd.f32 %v524_v42, %v1337_v55 }
  0xb5   : > { %373 = vst.sshfl [vmem:[#allocation1] sm:$0xff pattern:$0x75316420] %v371_v50  ;;  %362 = vrot.lane.b32.xlu0 %v361_v51, %s1227_s12  ;;  %v556_v21 = vmul.f32 0.125, %v315_v20  ;;  %v594_v28 = vmul.f32 0.875, %v315_v20  ;;  %v568_v46 = vmul.f32 0.375, %v315_v20 }
  0xb6   : > { %538 = vst.msk [vmem:[#allocation2 + $0x2c] sm:$0xf] %vm325_vm1, %v537_v3  ;;  %v527_v37 = vmax.f32 %v526_v44, 0.0  ;;  %v550_v47 = vmax.f32 %v549_v45, 0.0  ;;  %v582_v50 = vmul.f32 0.625, %v315_v20 }
  0xb7   : > { %548 = vst.msk [vmem:[#allocation2 + $0x30] sm:$0xf] %vm325_vm1, %v547_v4  ;;  %v558_v27 = vrot.slane %v556_v21, 4  ;;  %v570_v49 = vrot.slane %v568_v46, 4 }
  0xb8   : > { %v584_v59 = vrot.slane %v582_v50, 4 }
  0xb9   : > { %v608_v29 = vadd.f32 %v594_v28, %v558_v27  ;;  %v560_v40 = vadd.f32 %v558_v27, %v1346_v62  ;;  %v611_v51 = vadd.f32 %v582_v50, %v570_v49 }
  0xba   : > { %v586_v63 = vadd.f32 %v584_v59, %v1343_v60 }
  0xbb   : > { %v609_v32 = vmax.f32 %v608_v29, 0.0  ;;  %v561_v36 = vmax.f32 %v560_v40, 0.0  ;;  %v612_v53 = vmax.f32 %v611_v51, 0.0 }
  0xbc   : > { %v375_v57 = vld [vmem:[#allocation1 + $0x1] ss:$2 sm:$0xff]  ;;  %v587_v0 = vmax.f32 %v586_v63, 0.0 }
  0xbd   : > { %385 = vst.sshfl [vmem:[#allocation1] sm:$0xff pattern:$0x75316420] %v383_v54 }
  0xbe   : > { %377 = vst.msk [vmem:[#allocation2 + $0x8] sm:$0xf] %vm325_vm1, %v375_v57  ;;  %v572_v57 = vadd.f32 %v570_v49, %v1339_v56 }
  0xbf   : > { %610 = vst.msk [vmem:[#allocation2 + $0x3c] sm:$0xf] %vm325_vm1, %v609_v32 }
  0xc0   : > { %v573_v58 = vmax.f32 %v572_v57, 0.0 }
  0xc4   : > { %v387_v5 = vld [vmem:[#allocation1 + $0x1] ss:$2 sm:$0xff] }
  0xc5   : > { %419 = vst.sshfl [vmem:[#allocation1] sm:$0xff pattern:$0x75316420] %v417_v1  ;;  %388 = vrot.lane.b32.xlu1 %v387_v5, %s1227_s12  ;;  %v596_v1 = vrot.slane %v594_v28, 4 }
  0xc7   : > { %v598_v3 = vadd.f32 %v596_v1, %v1337_v55 }
  0xc9   : > { %v599_v56 = vmax.f32 %v598_v3, 0.0 }
  0xcc   : > { %v421_v10 = vld [vmem:[#allocation1 + $0x1] ss:$2 sm:$0xff] }
  0xcd   : > { %398 = vrot.lane.b32.xlu1 %v396_v8, %s1227_s12  ;;  %431 = vst.sshfl [vmem:[#allocation1] sm:$0xff pattern:$0x75316420] %v429_v9 }
  0xce   : > { %423 = vst.msk [vmem:[#allocation2 + $0x14] sm:$0xf] %vm325_vm1, %v421_v10 }
  0xd4   : > { %v433_v16 = vld [vmem:[#allocation1 + $0x1] ss:$2 sm:$0xff] }
  0xd5   : > { %470 = vrot.lane.b32.xlu1 %v468_v14, %s1227_s12  ;;  %434 = vrot.lane.b32.xlu2 %v433_v16, %s1227_s12  ;;  %445 = vst.sshfl [vmem:[#allocation1] sm:$0xff pattern:$0x75316420] %v443_v13  ;;  %v1403_v16 = vld [vmem:[%s1543_s2] sm:$0xf] }
  0xdc   : > { %v447_v24 = vld [vmem:[#allocation1 + $0x1] ss:$2 sm:$0xff] }
  0xdd   : > { %480 = vrot.lane.b32.xlu2 %v478_v23, %s1227_s12  ;;  %457 = vst.sshfl [vmem:[#allocation1] sm:$0xff pattern:$0x75316420] %v455_v22 }
  0xde   : > { %449 = vst.msk [vmem:[#allocation2 + $0x18] sm:$0xf] %vm325_vm1, %v447_v24 }
  0xe4   : > { %v459_v33 = vld [vmem:[#allocation1 + $0x1] ss:$2 sm:$0xff] }
  0xe5   : > { %460 = vrot.lane.b32.xlu0 %v459_v33, %s1227_s12  ;;  %491 = vst.sshfl [vmem:[#allocation1] sm:$0xff pattern:$0x75316420] %v489_v30  ;;  %542 = vrot.lane.b32.xlu2 %v540_v31, %s1227_s12  ;;  %v955_v30 = vld [vmem:[%s1544_s3] sm:$0xff]  ;;  %v1228_v31 = vmov 0  }
  0xe6   : > { %1184 = vset.pattern.permute.xlu1 %v1228_v31  ;;  %1185 = vset.pattern.permute.xlu2 %v1228_v31 }
  0xe7   : > { %1186 = vset.pattern.permute.xlu0 %v1228_v31 }
  0xec   : > { %v493_v38 = vld [vmem:[#allocation1 + $0x1] ss:$2 sm:$0xff] }
  0xed   : > { %503 = vst.sshfl [vmem:[#allocation1] sm:$0xff pattern:$0x75316420] %v501_v35 }
  0xee   : > { %495 = vst.msk [vmem:[#allocation2 + $0x24] sm:$0xf] %vm325_vm1, %v493_v38 }
  0xf4   : > { %v505_v43 = vld [vmem:[#allocation1 + $0x1] ss:$2 sm:$0xff] }
  0xf5   : > { %506 = vrot.lane.b32.xlu0 %v505_v43, %s1227_s12  ;;  %517 = vst.sshfl [vmem:[#allocation1] sm:$0xff pattern:$0x75316420] %v515_v41 }
  0xfc   : > { %v519_v48 = vld [vmem:[#allocation1 + $0x1] ss:$2 sm:$0xff] }
  0xfd   : > { %552 = vrot.lane.b32.xlu0 %v550_v47, %s1227_s12  ;;  %529 = vst.sshfl [vmem:[#allocation1] sm:$0xff pattern:$0x75316420] %v527_v37  ;;  %v977_v37 = vld [vmem:[%s1545_s4] sm:$0xff] }
  0xfe   : > { %521 = vst.msk [vmem:[#allocation2 + $0x28] sm:$0xf] %vm325_vm1, %v519_v48 }
  0xff   : > { %v409_v52 = vpop.permute.xlu2 %408 }
 0x100   : > { %411 = vst.msk [vmem:[#allocation2 + $0x10] sm:$0xf] %vm338_vm2, %v409_v52 }
 0x104   : > { %v531_v54 = vld [vmem:[#allocation1 + $0x1] ss:$2 sm:$0xff] }
 0x105   : > { %532 = vrot.lane.b32.xlu1 %v531_v54, %s1227_s12  ;;  %563 = vst.sshfl [vmem:[#allocation1] sm:$0xff pattern:$0x75316420] %v561_v36  ;;  %614 = vrot.lane.b32.xlu0 %v612_v53, %s1227_s12 }
 0x10c   : > { %v565_v61 = vld [vmem:[#allocation1 + $0x1] ss:$2 sm:$0xff] }
 0x10d   : > { %567 = vst.msk [vmem:[#allocation2 + $0x34] sm:$0xf] %vm325_vm1, %v565_v61 }
 0x10e   : > { %575 = vst.sshfl [vmem:[#allocation1] sm:$0xff pattern:$0x75316420] %v573_v58 }
 0x10f   : > { %v336_v62 = vpop.permute.xlu0 %335 }
 0x110   : > { %339 = vst.msk [vmem:[#allocation2] sm:$0xf] %vm338_vm2, %v336_v62 }
 0x115   : > { %v577_v2 = vld [vmem:[#allocation1 + $0x1] ss:$2 sm:$0xff] }
 0x116   : > { %578 = vrot.lane.b32.xlu1 %v577_v2, %s1227_s12  ;;  %589 = vst.sshfl [vmem:[#allocation1] sm:$0xff pattern:$0x75316420] %v587_v0 }
 0x11d   : > { %v591_v4 = vld [vmem:[#allocation1 + $0x1] ss:$2 sm:$0xff] }
 0x11e   : > { %593 = vst.msk [vmem:[#allocation2 + $0x38] sm:$0xf] %vm325_vm1, %v591_v4  ;;  %958 = vperm.xlu1 %1184, %v955_v30  }
 0x11f   : > { %601 = vst.sshfl [vmem:[#allocation1] sm:$0xff pattern:$0x75316420] %v599_v56 }
 0x126   : > { %v603_v5 = vld [vmem:[#allocation1 + $0x1] ss:$2 sm:$0xff] }
 0x127   : > { %604 = vrot.lane.b32.xlu2 %v603_v5, %s1227_s12  ;;  %v363_v6 = vpop.permute.xlu0 %362 }
 0x128   : > { %365 = vst.msk [vmem:[#allocation2 + $0x4] sm:$0xf] %vm338_vm2, %v363_v6 }
 0x12f   : > { %v619_v60 = vld [vmem:[#allocation2] sm:$0xff]  ;;  %v435_v7 = vpop.permute.xlu2 %434  ;;  %980 = vperm.xlu2 %1185, %v977_v37  }
 0x130   : > { %635 = vst [vmem:[#allocation1] ss:$2 sm:$0xff] %v619_v60 }
 0x131   : > { %437 = vst.msk [vmem:[#allocation2 + $0x14] sm:$0xf] %vm338_vm2, %v435_v7 }
 0x137   : > { %v389_v8 = vpop.permute.xlu1 %388  ;;  %v481_v9 = vpop.permute.xlu2 %480  ;;  %v642_v55 = vld.sshfl [vmem:[#allocation1] sm:$0xff pattern:$0x75316420]  ;;  %v643_v10 = vld.sshfl [vmem:[#allocation1 + $0x8] sm:$0xff pattern:$0x75316420] }
 0x138   : > { %v621_v11 = vld [vmem:[#allocation2 + $0x10] sm:$0xff]  ;;  %391 = vst.msk [vmem:[#allocation2 + $0x8] sm:$0xf] %vm338_vm2, %v389_v8  ;;  %v678_v12 = vpack.c.bf16 %v642_v55, %v642_v55  ;;  %v679_v13 = vpack.c.bf16 %v643_v10, %v643_v10 }
 0x139   : > { %639 = vst [vmem:[#allocation1 + $0x20] ss:$2 sm:$0xff] %v621_v11 }
 0x13a   : > { %483 = vst.msk [vmem:[#allocation2 + $0x20] sm:$0xf] %vm338_vm2, %v481_v9  ;;  %v700_v14 = vsel %vm698_vm3, %v678_v12, 0  ;;  %v703_v15 = vsel %vm698_vm3, %v679_v13, 0 }
 0x13b   : > { %754 = vmatpush.bf16.msra.mxu1 %v700_v14  ;;  %767 = vmatpush.bf16.msra.mxu2 %v703_v15 }
 0x13e   : > { %1123 = vmatmul.msk.bf16.vlgmr.msra.gmra.mxu2 %vm694_vm4, %v1403_v16  ;;  %1122 = vmatmul.msk.bf16.vlgmr.msra.gmra.mxu1 %vm694_vm4, %v1403_v16 }
 0x13f   : > { %v399_v17 = vpop.permute.xlu1 %398  ;;  %v543_v18 = vpop.permute.xlu2 %542 }
 0x140   : > { %401 = vst.msk [vmem:[#allocation2 + $0xc] sm:$0xf] %vm338_vm2, %v399_v17  ;;  %v646_v20 = vld.sshfl [vmem:[#allocation1 + $0x20] sm:$0xff pattern:$0x75316420] }
 0x141   : > { %545 = vst.msk [vmem:[#allocation2 + $0x2c] sm:$0xf] %vm338_vm2, %v543_v18  ;;  %v682_v21 = vpack.c.bf16 %v646_v20, %v646_v20  ;;  %v647_v25 = vld.sshfl [vmem:[#allocation1 + $0x28] sm:$0xff pattern:$0x75316420] }
 0x142   : > { %v683_v28 = vpack.c.bf16 %v647_v25, %v647_v25 }
 0x143   : > { %v712_v22 = vsel %vm698_vm3, %v682_v21, 0 }
 0x144   : > { %806 = vmatpush.bf16.msrb.mxu2 %v712_v22  ;;  %v715_v34 = vsel %vm698_vm3, %v683_v28, 0 }
 0x147   : > { %v620_v23 = vld [vmem:[#allocation2 + $0x8] sm:$0xff]  ;;  %v471_v24 = vpop.permute.xlu1 %470 }
 0x148   : > { %637 = vst [vmem:[#allocation1 + $0x10] ss:$2 sm:$0xff] %v620_v23 }
 0x149   : > { %473 = vst.msk [vmem:[#allocation2 + $0x1c] sm:$0xf] %vm338_vm2, %v471_v24 }
 0x14e   : > { %1126 = vmatmul.msk.bf16.vlgmr.msrb.gmra.mxu2 %vm694_vm4, %v1403_v16 }
 0x14f   : > { %v644_v26 = vld.sshfl [vmem:[#allocation1 + $0x10] sm:$0xff pattern:$0x75316420]  ;;  %v645_v27 = vld.sshfl [vmem:[#allocation1 + $0x18] sm:$0xff pattern:$0x75316420] }
 0x150   : > { %v680_v19 = vpack.c.bf16 %v644_v26, %v644_v26  ;;  %v681_v29 = vpack.c.bf16 %v645_v27, %v645_v27 }
 0x152   : > { %v706_v32 = vsel %vm698_vm3, %v680_v19, 0  ;;  %v709_v33 = vsel %vm698_vm3, %v681_v29, 0 }
 0x153   : > { %780 = vmatpush.bf16.msra.mxu3 %v706_v32  ;;  %793 = vmatpush.bf16.msrb.mxu1 %v709_v33 }
 0x156   : > { %1124 = vmatmul.msk.bf16.vlgmr.msra.gmra.mxu3 %vm694_vm4, %v1403_v16  ;;  %1125 = vmatmul.msk.bf16.vlgmr.msrb.gmra.mxu1 %vm694_vm4, %v1403_v16 }
 0x157   : > { %819 = vmatpush.bf16.msrb.mxu3 %v715_v34  ;;  %v461_v35 = vpop.permute.xlu0 %460 }
 0x158   : > { %463 = vst.msk [vmem:[#allocation2 + $0x18] sm:$0xf] %vm338_vm2, %v461_v35 }
 0x15f   : > { %v622_v38 = vld [vmem:[#allocation2 + $0x18] sm:$0xff] }
 0x160   : > { %641 = vst [vmem:[#allocation1 + $0x30] ss:$2 sm:$0xff] %v622_v38 }
 0x166   : > { %1127 = vmatmul.msk.bf16.vlgmr.msrb.gmra.mxu3 %vm694_vm4, %v1403_v16 }
 0x167   : > { %v507_v39 = vpop.permute.xlu0 %506  ;;  %v648_v41 = vld.sshfl [vmem:[#allocation1 + $0x30] sm:$0xff pattern:$0x75316420]  ;;  %v649_v42 = vld.sshfl [vmem:[#allocation1 + $0x38] sm:$0xff pattern:$0x75316420] }
 0x168   : > { %509 = vst.msk [vmem:[#allocation2 + $0x24] sm:$0xf] %vm338_vm2, %v507_v39  ;;  %v684_v43 = vpack.c.bf16 %v648_v41, %v648_v41  ;;  %v685_v44 = vpack.c.bf16 %v649_v42, %v649_v42 }
 0x16a   : > { %v718_v45 = vsel %vm698_vm3, %v684_v43, 0  ;;  %v721_v46 = vsel %vm698_vm3, %v685_v44, 0 }
 0x16b   : > { %832 = vmatpush.bf16.msra.mxu1 %v718_v45  ;;  %845 = vmatpush.bf16.msra.mxu2 %v721_v46 }
 0x16e   : > { %1129 = vmatmul.msk.bf16.vlgmr.msra.gmra.mxu2 %vm694_vm4, %v1403_v16  ;;  %1128 = vmatmul.msk.bf16.vlgmr.msra.gmra.mxu1 %vm694_vm4, %v1403_v16 }
 0x16f   : > { %v623_v47 = vld [vmem:[#allocation2 + $0x20] sm:$0xff]  ;;  %v553_v48 = vpop.permute.xlu0 %552 }
 0x170   : > { %650 = vst [vmem:[#allocation1] ss:$2 sm:$0xff] %v623_v47 }
 0x171   : > { %555 = vst.msk [vmem:[#allocation2 + $0x30] sm:$0xf] %vm338_vm2, %v553_v48 }
 0x177   : > { %v533_v49 = vpop.permute.xlu1 %532  ;;  %v615_v50 = vpop.permute.xlu0 %614  ;;  %v654_v40 = vld.sshfl [vmem:[#allocation1] sm:$0xff pattern:$0x75316420]  ;;  %v655_v51 = vld.sshfl [vmem:[#allocation1 + $0x8] sm:$0xff pattern:$0x75316420] }
 0x178   : > { %535 = vst.msk [vmem:[#allocation2 + $0x28] sm:$0xf] %vm338_vm2, %v533_v49  ;;  %v686_v52 = vpack.c.bf16 %v654_v40, %v654_v40  ;;  %v687_v36 = vpack.c.bf16 %v655_v51, %v655_v51 }
 0x179   : > { %617 = vst.msk [vmem:[#allocation2 + $0x3c] sm:$0xf] %vm338_vm2, %v615_v50 }
 0x17a   : > { %v724_v53 = vsel %vm698_vm3, %v686_v52, 0  ;;  %v727_v54 = vsel %vm698_vm3, %v687_v36, 0 }
 0x17b   : > { %858 = vmatpush.bf16.msra.mxu3 %v724_v53  ;;  %871 = vmatpush.bf16.msrb.mxu0 %v727_v54 }
 0x17e   : > { %1130 = vmatmul.msk.bf16.vlgmr.msra.gmra.mxu3 %vm694_vm4, %v1403_v16  ;;  %1131 = vmatmul.msk.bf16.vlgmr.msrb.gmra.mxu0 %vm694_vm4, %v1403_v16 }
 0x17f   : > { %v624_v57 = vld [vmem:[#allocation2 + $0x28] sm:$0xff] }
 0x180   : > { %651 = vst [vmem:[#allocation1 + $0x10] ss:$2 sm:$0xff] %v624_v57 }
 0x181   : > { %v605_v58 = vpop.permute.xlu2 %604 }
 0x182   : > { %607 = vst.msk [vmem:[#allocation2 + $0x38] sm:$0xf] %vm338_vm2, %v605_v58 }
 0x187   : > { %v656_v59 = vld.sshfl [vmem:[#allocation1 + $0x10] sm:$0xff pattern:$0x75316420]  ;;  %v657_v61 = vld.sshfl [vmem:[#allocation1 + $0x18] sm:$0xff pattern:$0x75316420] }
 0x188   : > { %v579_v62 = vpop.permute.xlu1 %578  ;;  %v688_v63 = vpack.c.bf16 %v656_v59, %v656_v59  ;;  %v689_v0 = vpack.c.bf16 %v657_v61, %v657_v61 }
 0x189   : > { %v626_v1 = vld [vmem:[#allocation2 + $0x38] sm:$0xff]  ;;  %581 = vst.msk [vmem:[#allocation2 + $0x34] sm:$0xf] %vm338_vm2, %v579_v62 }
 0x18a   : > { %653 = vst [vmem:[#allocation1 + $0x30] ss:$2 sm:$0xff] %v626_v1  ;;  %v730_v2 = vsel %vm698_vm3, %v688_v63, 0  ;;  %v733_v3 = vsel %vm698_vm3, %v689_v0, 0 }
 0x18b   : > { %884 = vmatpush.bf16.msrb.mxu1 %v730_v2  ;;  %897 = vmatpush.bf16.msrb.mxu2 %v733_v3 }
 0x18e   : > { %1133 = vmatmul.msk.bf16.vlgmr.msrb.gmra.mxu2 %vm694_vm4, %v1403_v16  ;;  %1132 = vmatmul.msk.bf16.vlgmr.msrb.gmra.mxu1 %vm694_vm4, %v1403_v16 }
 0x190   : > { %v625_v56 = vld [vmem:[#allocation2 + $0x30] sm:$0xff]  ;;  %v1469_v18 = vpop.permute.xlu1 %958 }
 0x191   : > { %652 = vst [vmem:[#allocation1 + $0x20] ss:$2 sm:$0xff] %v625_v56  ;;  %v660_v4 = vld.sshfl [vmem:[#allocation1 + $0x30] sm:$0xff pattern:$0x75316420] }
 0x192   : > { %v692_v5 = vpack.c.bf16 %v660_v4, %v660_v4  ;;  %v661_v6 = vld.sshfl [vmem:[#allocation1 + $0x38] sm:$0xff pattern:$0x75316420] }
 0x193   : > { %v693_v60 = vpack.c.bf16 %v661_v6, %v661_v6 }
 0x194   : > { %v742_v7 = vsel %vm698_vm3, %v692_v5, 0 }
 0x195   : > { %936 = vmatpush.bf16.msra.mxu1 %v742_v7  ;;  %v745_v8 = vsel %vm698_vm3, %v693_v60, 0 }
 0x196   : > { %949 = vmatpush.bf16.msra.mxu2 %v745_v8 }
 0x198   : > { %v658_v9 = vld.sshfl [vmem:[#allocation1 + $0x20] sm:$0xff pattern:$0x75316420]  ;;  %v659_v55 = vld.sshfl [vmem:[#allocation1 + $0x28] sm:$0xff pattern:$0x75316420] }
 0x199   : > { %v690_v10 = vpack.c.bf16 %v658_v9, %v658_v9  ;;  %v691_v11 = vpack.c.bf16 %v659_v55, %v659_v55 }
 0x19b   : > { %v736_v12 = vsel %vm698_vm3, %v690_v10, 0  ;;  %v739_v13 = vsel %vm698_vm3, %v691_v11, 0 }
 0x19c   : > { %910 = vmatpush.bf16.msrb.mxu3 %v736_v12  ;;  %923 = vmatpush.bf16.msra.mxu0 %v739_v13 }
 0x19e   : > { %1137 = vmatmul.msk.bf16.vlgmr.msra.gmra.mxu2 %vm694_vm4, %v1403_v16  ;;  %1136 = vmatmul.msk.bf16.vlgmr.msra.gmra.mxu1 %vm694_vm4, %v1403_v16 }
 0x19f   : > { %1134 = vmatmul.msk.bf16.vlgmr.msrb.gmra.mxu3 %vm694_vm4, %v1403_v16  ;;  %1135 = vmatmul.msk.bf16.vlgmr.msra.gmra.mxu0 %vm694_vm4, %v1403_v16  ;;  %v1478_v16 = vpop.permute.xlu2 %980 }
 0x1bb   : > { %v756_v14 = vpop.f32.mrf.mxu1 }
 0x1bc   : > { %v961_v20 = vmul.f32 %v1469_v18, %v756_v14 }
 0x1be   : > { %v983_v22 = vadd.f32 %v1478_v16, %v961_v20 }
 0x1c0   : > { %999 = vst [vmem:[%s1476_s7] sm:$0xff] %v983_v22 }
 0x1c1   : > { %v769_v15 = vpop.f32.mrf.mxu2 }
 0x1c2   : > { %v962_v21 = vmul.f32 %v1469_v18, %v769_v15 }
 0x1c3   : > { %v758_v17 = vpop.f32.mrf.mxu1 }
 0x1c4   : > { %v984_v23 = vadd.f32 %v1478_v16, %v962_v21 }
 0x1c6   : > { %1000 = vst [vmem:[%s1476_s7 + $0x8] sm:$0xff] %v984_v23 }
 0x1c9   : > { %v771_v24 = vpop.f32.mrf.mxu2 }
 0x1d1   : > { %v808_v25 = vpop.f32.mrf.mxu2 }
 0x1d2   : > { %v965_v26 = vmul.f32 %v1469_v18, %v808_v25 }
 0x1d3   : > { %v795_v27 = vpop.f32.mrf.mxu1 }
 0x1d4   : > { %v964_v28 = vmul.f32 %v1469_v18, %v795_v27  ;;  %v987_v19 = vadd.f32 %v1478_v16, %v965_v26 }
 0x1d6   : > { %v986_v29 = vadd.f32 %v1478_v16, %v964_v28  ;;  %1003 = vst [vmem:[%s1476_s7 + $0x20] sm:$0xff] %v987_v19 }
 0x1d8   : > { %1002 = vst [vmem:[%s1476_s7 + $0x18] sm:$0xff] %v986_v29 }
 0x1d9   : > { %v782_v30 = vpop.f32.mrf.mxu3  ;;  %v810_v31 = vpop.f32.mrf.mxu2 }
 0x1da   : > { %v963_v32 = vmul.f32 %v1469_v18, %v782_v30 }
 0x1db   : > { %v797_v33 = vpop.f32.mrf.mxu1 }
 0x1dc   : > { %v985_v34 = vadd.f32 %v1478_v16, %v963_v32 }
 0x1de   : > { %1001 = vst [vmem:[%s1476_s7 + $0x10] sm:$0xff] %v985_v34 }
 0x1e1   : > { %v784_v35 = vpop.f32.mrf.mxu3 }
 0x1e9   : > { %v821_v38 = vpop.f32.mrf.mxu3 }
 0x1ea   : > { %v966_v39 = vmul.f32 %v1469_v18, %v821_v38 }
 0x1eb   : > { %v834_v41 = vpop.f32.mrf.mxu1 }
 0x1ec   : > { %v988_v42 = vadd.f32 %v1478_v16, %v966_v39  ;;  %v967_v43 = vmul.f32 %v1469_v18, %v834_v41 }
 0x1ee   : > { %1004 = vst [vmem:[%s1476_s7 + $0x28] sm:$0xff] %v988_v42  ;;  %v989_v44 = vadd.f32 %v1478_v16, %v967_v43 }
 0x1f0   : > { %1005 = vst [vmem:[%s1476_s7 + $0x30] sm:$0xff] %v989_v44 }
 0x1f1   : > { %v847_v45 = vpop.f32.mrf.mxu2  ;;  %v823_v46 = vpop.f32.mrf.mxu3 }
 0x1f2   : > { %v968_v37 = vmul.f32 %v1469_v18, %v847_v45 }
 0x1f3   : > { %v836_v47 = vpop.f32.mrf.mxu1 }
 0x1f4   : > { %v990_v48 = vadd.f32 %v1478_v16, %v968_v37 }
 0x1f6   : > { %1006 = vst [vmem:[%s1476_s7 + $0x38] sm:$0xff] %v990_v48 }
 0x1f9   : > { %v849_v49 = vpop.f32.mrf.mxu2 }
 0x1fb   : > { %v873_v50 = vpop.f32.mrf.mxu0 }
 0x1fc   : > { %v970_v40 = vmul.f32 %v1469_v18, %v873_v50 }
 0x1fe   : > { %v992_v51 = vadd.f32 %v1478_v16, %v970_v40 }
 0x200   : > { %1008 = vst [vmem:[%s1476_s7 + $0x48] sm:$0xff] %v992_v51 }
 0x201   : > { %v860_v52 = vpop.f32.mrf.mxu3 }
 0x202   : > { %v969_v36 = vmul.f32 %v1469_v18, %v860_v52 }
 0x203   : > { %v875_v53 = vpop.f32.mrf.mxu0 }
 0x204   : > { %v991_v54 = vadd.f32 %v1478_v16, %v969_v36 }
 0x206   : > { %1007 = vst [vmem:[%s1476_s7 + $0x40] sm:$0xff] %v991_v54 }
 0x209   : > { %v862_v57 = vpop.f32.mrf.mxu3 }
 0x20b   : > { %v886_v58 = vpop.f32.mrf.mxu1 }
 0x20c   : > { %v971_v59 = vmul.f32 %v1469_v18, %v886_v58 }
 0x20e   : > { %v993_v61 = vadd.f32 %v1478_v16, %v971_v59 }
 0x210   : > { %1009 = vst [vmem:[%s1476_s7 + $0x50] sm:$0xff] %v993_v61 }
 0x211   : > { %v899_v62 = vpop.f32.mrf.mxu2 }
 0x212   : > { %v972_v63 = vmul.f32 %v1469_v18, %v899_v62 }
 0x213   : > { %v888_v0 = vpop.f32.mrf.mxu1 }
 0x214   : > { %v994_v1 = vadd.f32 %v1478_v16, %v972_v63 }
 0x216   : > { %1010 = vst [vmem:[%s1476_s7 + $0x58] sm:$0xff] %v994_v1 }
 0x219   : > { %v901_v2 = vpop.f32.mrf.mxu2 }
 0x21b   : > { %v938_v3 = vpop.f32.mrf.mxu1 }
 0x21c   : > { %v925_v56 = vpop.f32.mrf.mxu0  ;;  %v975_v4 = vmul.f32 %v1469_v18, %v938_v3 }
 0x21d   : > { %v974_v5 = vmul.f32 %v1469_v18, %v925_v56 }
 0x21e   : > { %v997_v6 = vadd.f32 %v1478_v16, %v975_v4 }
 0x21f   : > { %v996_v60 = vadd.f32 %v1478_v16, %v974_v5 }
 0x220   : > { %1013 = vst [vmem:[%s1476_s7 + $0x70] sm:$0xff] %v997_v6 }
 0x221   : > { %1012 = vst [vmem:[%s1476_s7 + $0x68] sm:$0xff] %v996_v60  ;;  %v951_v7 = vpop.f32.mrf.mxu2 }
 0x222   : > { %v912_v8 = vpop.f32.mrf.mxu3  ;;  %v976_v9 = vmul.f32 %v1469_v18, %v951_v7 }
 0x223   : > { %v973_v55 = vmul.f32 %v1469_v18, %v912_v8  ;;  %v940_v10 = vpop.f32.mrf.mxu1 }
 0x224   : > { %v998_v11 = vadd.f32 %v1478_v16, %v976_v9  ;;  %v927_v12 = vpop.f32.mrf.mxu0 }
 0x225   : > { %v995_v13 = vadd.f32 %v1478_v16, %v973_v55 }
 0x226   : > { %1014 = vst [vmem:[%s1476_s7 + $0x78] sm:$0xff] %v998_v11 }
 0x227   : > { %1011 = vst [vmem:[%s1476_s7 + $0x60] sm:$0xff] %v995_v13 }
 0x229   : > { %v953_v14 = vpop.f32.mrf.mxu2 }
 0x22a   : > { %v914_v15 = vpop.f32.mrf.mxu3 }
 0x22b PF: > { %s15_s22 = sadd.s32 1, %s1225_s22   ;;  %s1547_s18 = smov %s1217_s20 }
 0x22c   : > { %p12_p8 = scmp.ge.s32.totalorder %s15_s22, 6   ;;  %s1548_s19 = smov %s1221_s21 }
 0x22d   : > { %s1549_s20 = smov %s1552_s23  ;;  %s1550_s21 = smov %s1556_s24 }
 0x22e   :  { %14 = sbr.rel (!%p12_p8) target bundleno = 3 (0x3), region = 89 }

// kernel: double_factorized_increase.2
= control target key start
LH: loop header
LB: loop body
LE: loop exit
PB: predicated region body
PF: predicated region fallthrough
CT: control target
= control target key end

     0   :  { %s1245_s9 = smov 0   ;;  %s1247_s10 = smov 0   ;;  %s1489_s0 = inlined_call_operand.vmem [shape: f32[2,2,40,16], index: 0, kind: input, shape index: {}]   ;;  %s1490_s1 = inlined_call_operand.vmem [shape: f32[16,64], index: 1, kind: input, shape index: {}]   ;;  %s1491_s2 = inlined_call_operand.vmem [shape: f32[2,2,4,5], index: 2, kind: output, shape index: {}]  }
   0x1   :  { %s1249_s11 = smov 0   ;;  %s1251_s12 = smov 0  }
   0x2   :  { %s1253_s13 = smov 0  }
   0x3 LB: > { %s21_s14 = sadd.s32 1, %s1218_s11  ;;  %s24_s15 = sadd.s32 1, %s1222_s12  ;;  %s1226_s13 = sphi %s1253_s13, %s12_s13   ;;  %s1222_s12 = sphi %s1251_s12, %s1495_s12   ;;  %s1218_s11 = sphi %s1249_s11, %s1494_s11   ;;  %s1214_s10 = sphi %s1247_s10, %s1493_s10   ;;  %s1210_s9 = sphi %s1245_s9, %s1492_s9  }
   0x4   : > { %p22_p0 = scmp.ge.s32.totalorder %s21_s14, 2  ;;  %p1133_p1 = scmp.ge.s32.totalorder %s1226_s13, 1 }
   0x5   : > { %p132_p2 = scmp.lt.s32.totalorder %s1226_s13, 5 }
   0x6   : > { %s1497_s14 = smov (%p22_p0, %s21_s14), 0  ;;  %s1499_s15 = smov (!%p22_p0, %s24_s15), %s1222_s12 }
   0x7   : > { %p133_p3 = pnand %p1133_p1, %p132_p2  ;;  %p26_p4 = scmp.ge.s32.totalorder %s1499_s15, 2 }
   0x8   : > { %p161_p5 = scmp.lt.s32.totalorder (!%p133_p3), %s1214_s10, 1  ;;  %p163_p6 = scmp.lt.s32.totalorder (!%p133_p3), %s1210_s9, 1 }
   0x9   : > { %s1501_s15 = smov (%p26_p4, %s1499_s15), 0  ;;  %136 = sbr.rel (%p133_p3) target bundleno = 689 (0x2b1), region = 28 }
   0xa   : > { %s1228_s27 = smov (!%p133_p3), 64   ;;  %s1229_s6 = smov (!%p133_p3), 1  }
   0xe   : > { %v184_v0 = vld [vmem:[%s1490_s1 + $0x8] sm:$0xff]  ;;  %v183_v1 = vld [vmem:[%s1490_s1] sm:$0xff]  ;;  %s1503_s10 = smov (!%p161_p5, %s1214_s10), 1  ;;  %s1505_s9 = smov (!%p163_p6, %s1210_s9), 1  ;;  %vm185_vm0 = vcmask 130048   ;;  %vm240_vm1 = vcmask 519168  }
   0xf   : > { %215 = vmatpush.msra.mxu0 %v184_v0  ;;  %s1145_s20 = smul.u32 10, %s1503_s10  ;;  %vm253_vm2 = vcmask 1043968   ;;  %vm592_vm3 = vcmask 1043456   ;;  %s1135_s28 = sshll.u32 %s1503_s10, 1  ;;  %vm626_vm4 = vcmask 3072   ;;  %vm1038_vm5 = vcmask 35848  }
  0x10   : > { %s1144_s21 = smul.u32 5, %s1505_s9  ;;  %s175_s29 = sadd.s32 %s1135_s28, %s1505_s9 }
  0x11   : > { %216 = vmatpush.msra.mxu0 %v183_v1  ;;  %s1136_s30 = sshll.u32 %s175_s29, 2 }
  0x12   : > { %s167_s22 = sadd.s32 %s1145_s20, %s1144_s21  ;;  %s1470_s5 = scalar_lea.vmem %s1491_s2, %s1136_s30 }
  0x13   : > { %s1134_s23 = sshll.u32 %s167_s22, 3 }
  0x14   : > { %s169_s26 = scalar_lea.vmem %s1489_s0, %s1134_s23 }
  0x15   : > { %v178_v2 = vld [vmem:[%s169_s26] sm:$0xff]  ;;  %v179_v3 = vld [vmem:[%s169_s26 + $0x8] sm:$0xff]  ;;  %v180_v4 = vld [vmem:[%s169_s26 + $0x10] sm:$0xff] }
  0x16   : > { %1137 = vmatmul.msk.f32.vlgmr.msra.gmra.mxu0 %vm185_vm0, %v178_v2  ;;  %v181_v5 = vld [vmem:[%s169_s26 + $0x18] sm:$0xff]  ;;  %v182_v6 = vld [vmem:[%s169_s26 + $0x20] sm:$0xff] }
  0x1e   : > { %1138 = vmatmul.msk.f32.gmra.mxu0 %vm185_vm0, %v179_v3 }
  0x26   : > { %1139 = vmatmul.msk.f32.gmra.mxu0 %vm185_vm0, %v180_v4 }
  0x2e   : > { %1140 = vmatmul.msk.f32.gmra.mxu0 %vm185_vm0, %v181_v5 }
  0x36   : > { %1141 = vmatmul.msk.f32.gmra.mxu0 %vm185_vm0, %v182_v6 }
  0x93   : > { %v218_v7 = vpop.f32.mrf.mxu0 }
  0x94   : > { %v234_v8 = vmul.f32 0.625, %v218_v7  ;;  %v243_v9 = vmul.f32 0.875, %v218_v7  ;;  %v233_v10 = vmul.f32 0.375, %v218_v7  ;;  %v1290_v12 = vmul.f32 0.125, %v218_v7 }
  0x96   : > { %v236_v11 = vrot.slane %v234_v8, 4  ;;  %v245_v13 = vrot.slane %v243_v9, 4 }
  0x98   : > { %v247_v14 = vadd.f32 %v245_v13, %v1290_v12  ;;  %v238_v15 = vadd.f32 %v236_v11, %v233_v10 }
  0x9a   : > { %v248_v16 = vmax.f32 %v247_v14, 0.0  ;;  %v239_v17 = vmax.f32 %v238_v15, 0.0 }
  0x9b   : > { %v221_v18 = vpop.f32.mrf.mxu0 }
  0x9c   : > { %v1293_v19 = vmul.f32 0.125, %v221_v18  ;;  %v1295_v20 = vmul.f32 0.375, %v221_v18  ;;  %v1297_v21 = vmul.f32 0.625, %v221_v18  ;;  %v1299_v22 = vmul.f32 0.875, %v221_v18  ;;  %250 = vrot.lane.b32.xlu0 %v248_v16, %s1228_s27  ;;  %241 = vst.msk [vmem:[#allocation2] sm:$0xf] %vm240_vm1, %v239_v17 }
  0x9e   : > { %v257_v23 = vrot.slane %v1293_v19, 4  ;;  %v283_v24 = vrot.slane %v1297_v21, 4  ;;  %v269_v25 = vrot.slane %v1295_v20, 4  ;;  %v295_v26 = vrot.slane %v1299_v22, 4 }
  0xa0   : > { %v259_v27 = vadd.f32 %v257_v23, %v243_v9  ;;  %v310_v28 = vadd.f32 %v1297_v21, %v269_v25  ;;  %v320_v29 = vadd.f32 %v295_v26, %v1293_v19  ;;  %v317_v30 = vadd.f32 %v283_v24, %v1295_v20 }
  0xa1   : > { %v307_v31 = vadd.f32 %v1299_v22, %v257_v23  ;;  %v271_v43 = vadd.f32 %v269_v25, %v234_v8  ;;  %v285_v57 = vadd.f32 %v283_v24, %v233_v10  ;;  %v297_v0 = vadd.f32 %v295_v26, %v1290_v12 }
  0xa2   : > { %v260_v32 = vmax.f32 %v259_v27, 0.0  ;;  %v311_v33 = vmax.f32 %v310_v28, 0.0  ;;  %v321_v35 = vmax.f32 %v320_v29, 0.0  ;;  %v318_v36 = vmax.f32 %v317_v30, 0.0 }
  0xa3   : > { %v224_v34 = vpop.f32.mrf.mxu0  ;;  %v308_v37 = vmax.f32 %v307_v31, 0.0  ;;  %v272_v51 = vmax.f32 %v271_v43, 0.0  ;;  %v286_v59 = vmax.f32 %v285_v57, 0.0  ;;  %v298_v3 = vmax.f32 %v297_v0, 0.0 }
  0xa4   : > { %262 = vst.sshfl [vmem:[#allocation1] sm:$0xff pattern:$0x75316420] %v260_v32  ;;  %v1311_v38 = vmul.f32 0.125, %v224_v34  ;;  %v1313_v39 = vmul.f32 0.375, %v224_v34  ;;  %v1315_v40 = vmul.f32 0.625, %v224_v34  ;;  %313 = vrot.lane.b32.xlu1 %v311_v33, %s1228_s27  ;;  %323 = vrot.lane.b32.xlu2 %v321_v35, %s1228_s27 }
  0xa5   : > { %v1318_v41 = vmul.f32 0.875, %v224_v34  ;;  %319 = vst.msk [vmem:[#allocation2 + $0x10] sm:$0xf] %vm240_vm1, %v318_v36 }
  0xa6   : > { %v341_v42 = vrot.slane %v1313_v39, 4  ;;  %309 = vst.msk [vmem:[#allocation2 + $0xc] sm:$0xf] %vm240_vm1, %v308_v37  ;;  %v329_v44 = vrot.slane %v1311_v38, 4  ;;  %v355_v45 = vrot.slane %v1315_v40, 4 }
  0xa7   : > { %v367_v46 = vrot.slane %v1318_v41, 4 }
  0xa8   : > { %v1328_v47 = vadd.f32 %v1315_v40, %v341_v42  ;;  %v389_v49 = vadd.f32 %v355_v45, %v1313_v39  ;;  %v379_v50 = vadd.f32 %v1318_v41, %v329_v44  ;;  %v331_v8 = vadd.f32 %v329_v44, %v1299_v22 }
  0xa9   : > { %v392_v48 = vadd.f32 %v367_v46, %v1311_v38  ;;  %v343_v18 = vadd.f32 %v341_v42, %v1297_v21  ;;  %v357_v24 = vadd.f32 %v355_v45, %v1295_v20  ;;  %v369_v27 = vadd.f32 %v367_v46, %v1293_v19 }
  0xaa   : > { %v390_v54 = vmax.f32 %v389_v49, 0.0  ;;  %v380_v55 = vmax.f32 %v379_v50, 0.0  ;;  %v332_v14 = vmax.f32 %v331_v8, 0.0 }
  0xab   : > { %v264_v52 = vld [vmem:[#allocation1 + $0x1] ss:$2 sm:$0xff]  ;;  %v393_v53 = vmax.f32 %v392_v48, 0.0  ;;  %v227_v56 = vpop.f32.mrf.mxu0  ;;  %v344_v22 = vmax.f32 %v343_v18, 0.0  ;;  %v358_v25 = vmax.f32 %v357_v24, 0.0  ;;  %v370_v30 = vmax.f32 %v369_v27, 0.0 }
  0xac   : > { %274 = vst.sshfl [vmem:[#allocation1] sm:$0xff pattern:$0x75316420] %v272_v51  ;;  %v1336_v58 = vmul.f32 0.375, %v227_v56  ;;  %v1339_v61 = vmul.f32 0.625, %v227_v56  ;;  %v1347_v1 = vmul.f32 0.875, %v227_v56 }
  0xad   : > { %395 = vrot.lane.b32.xlu0 %v393_v53, %s1228_s27  ;;  %266 = vst.msk [vmem:[#allocation2 + $0x4] sm:$0xf] %vm240_vm1, %v264_v52  ;;  %v1349_v4 = vmul.f32 0.125, %v227_v56 }
  0xae   : > { %391 = vst.msk [vmem:[#allocation2 + $0x20] sm:$0xf] %vm240_vm1, %v390_v54  ;;  %v413_v62 = vrot.slane %v1336_v58, 4  ;;  %v439_v6 = vrot.slane %v1347_v1, 4  ;;  %v427_v10 = vrot.slane %v1339_v61, 4 }
  0xaf   : > { %381 = vst.msk [vmem:[#allocation2 + $0x1c] sm:$0xf] %vm240_vm1, %v380_v55  ;;  %v401_v9 = vrot.slane %v1349_v4, 4 }
  0xb0   : > { %v454_v63 = vadd.f32 %v1339_v61, %v413_v62  ;;  %v464_v7 = vadd.f32 %v439_v6, %v1349_v4  ;;  %v461_v12 = vadd.f32 %v427_v10, %v1336_v58  ;;  %v415_v45 = vadd.f32 %v413_v62, %v1315_v40 }
  0xb1   : > { %v451_v11 = vadd.f32 %v1347_v1, %v401_v9  ;;  %v403_v34 = vadd.f32 %v401_v9, %v1318_v41  ;;  %v429_v48 = vadd.f32 %v427_v10, %v1313_v39  ;;  %v441_v51 = vadd.f32 %v439_v6, %v1311_v38 }
  0xb2   : > { %v455_v2 = vmax.f32 %v454_v63, 0.0  ;;  %v465_v13 = vmax.f32 %v464_v7, 0.0  ;;  %v462_v16 = vmax.f32 %v461_v12, 0.0  ;;  %v416_v41 = vmax.f32 %v415_v45, 0.0 }
  0xb3   : > { %v276_v60 = vld [vmem:[#allocation1 + $0x1] ss:$2 sm:$0xff]  ;;  %v452_v15 = vmax.f32 %v451_v11, 0.0  ;;  %v230_v28 = vpop.f32.mrf.mxu0  ;;  %v404_v43 = vmax.f32 %v403_v34, 0.0  ;;  %v430_v49 = vmax.f32 %v429_v48, 0.0  ;;  %v442_v52 = vmax.f32 %v441_v51, 0.0 }
  0xb4   : > { %288 = vst.sshfl [vmem:[#allocation1] sm:$0xff pattern:$0x75316420] %v286_v59  ;;  %v483_v29 = vmul.f32 0.375, %v230_v28  ;;  %v471_v21 = vmul.f32 0.125, %v230_v28  ;;  %v497_v33 = vmul.f32 0.625, %v230_v28 }
  0xb5   : > { %277 = vrot.lane.b32.xlu0 %v276_v60, %s1228_s27  ;;  %453 = vst.msk [vmem:[#allocation2 + $0x2c] sm:$0xf] %vm240_vm1, %v452_v15  ;;  %v509_v35 = vmul.f32 0.875, %v230_v28  ;;  %v383_v38 = vmax.f32 %v1328_v47, 0.0 }
  0xb6   : > { %463 = vst.msk [vmem:[#allocation2 + $0x30] sm:$0xf] %vm240_vm1, %v462_v16  ;;  %v485_v32 = vrot.slane %v483_v29, 4  ;;  %v473_v20 = vrot.slane %v471_v21, 4  ;;  %v499_v59 = vrot.slane %v497_v33, 4 }
  0xb8   : > { %v526_v36 = vadd.f32 %v497_v33, %v485_v32  ;;  %v523_v37 = vadd.f32 %v509_v35, %v473_v20  ;;  %v475_v40 = vadd.f32 %v473_v20, %v1347_v1  ;;  %v487_v56 = vadd.f32 %v485_v32, %v1339_v61 }
  0xb9   : > { %v501_v63 = vadd.f32 %v499_v59, %v1336_v58  ;;  %v511_v1 = vrot.slane %v509_v35, 4 }
  0xba   : > { %v527_v42 = vmax.f32 %v526_v36, 0.0  ;;  %v524_v44 = vmax.f32 %v523_v37, 0.0  ;;  %v476_v39 = vmax.f32 %v475_v40, 0.0  ;;  %v488_v57 = vmax.f32 %v487_v56, 0.0 }
  0xbb   : > { %v290_v5 = vld [vmem:[#allocation1 + $0x1] ss:$2 sm:$0xff]  ;;  %v502_v0 = vmax.f32 %v501_v63, 0.0  ;;  %v513_v61 = vadd.f32 %v511_v1, %v1349_v4 }
  0xbc   : > { %300 = vst.sshfl [vmem:[#allocation1] sm:$0xff pattern:$0x75316420] %v298_v3 }
  0xbd   : > { %457 = vrot.lane.b32.xlu0 %v455_v2, %s1228_s27  ;;  %292 = vst.msk [vmem:[#allocation2 + $0x8] sm:$0xf] %vm240_vm1, %v290_v5  ;;  %v514_v3 = vmax.f32 %v513_v61, 0.0 }
  0xbe   : > { %525 = vst.msk [vmem:[#allocation2 + $0x3c] sm:$0xf] %vm240_vm1, %v524_v44 }
  0xc3   : > { %v302_v17 = vld [vmem:[#allocation1 + $0x1] ss:$2 sm:$0xff] }
  0xc4   : > { %334 = vst.sshfl [vmem:[#allocation1] sm:$0xff pattern:$0x75316420] %v332_v14  ;;  %303 = vrot.lane.b32.xlu1 %v302_v17, %s1228_s27 }
  0xc5   : > { %467 = vrot.lane.b32.xlu0 %v465_v13, %s1228_s27 }
  0xcb   : > { %v336_v23 = vld [vmem:[#allocation1 + $0x1] ss:$2 sm:$0xff] }
  0xcc   : > { %346 = vst.sshfl [vmem:[#allocation1] sm:$0xff pattern:$0x75316420] %v344_v22 }
  0xcd   : > { %338 = vst.msk [vmem:[#allocation2 + $0x14] sm:$0xf] %vm240_vm1, %v336_v23  ;;  %529 = vrot.lane.b32.xlu0 %v527_v42, %s1228_s27 }
  0xd3   : > { %v348_v26 = vld [vmem:[#allocation1 + $0x1] ss:$2 sm:$0xff] }
  0xd4   : > { %349 = vrot.lane.b32.xlu2 %v348_v26, %s1228_s27  ;;  %360 = vst.sshfl [vmem:[#allocation1] sm:$0xff pattern:$0x75316420] %v358_v25 }
  0xdb   : > { %v362_v31 = vld [vmem:[#allocation1 + $0x1] ss:$2 sm:$0xff] }
  0xdc   : > { %372 = vst.sshfl [vmem:[#allocation1] sm:$0xff pattern:$0x75316420] %v370_v30 }
  0xdd   : > { %364 = vst.msk [vmem:[#allocation2 + $0x18] sm:$0xf] %vm240_vm1, %v362_v31 }
  0xe3   : > { %v374_v19 = vld [vmem:[#allocation1 + $0x1] ss:$2 sm:$0xff] }
  0xe4   : > { %375 = vrot.lane.b32.xlu1 %v374_v19, %s1228_s27  ;;  %406 = vst.sshfl [vmem:[#allocation1] sm:$0xff pattern:$0x75316420] %v404_v43 }
  0xeb   : > { %v408_v46 = vld [vmem:[#allocation1 + $0x1] ss:$2 sm:$0xff] }
  0xec   : > { %418 = vst.sshfl [vmem:[#allocation1] sm:$0xff pattern:$0x75316420] %v416_v41 }
  0xed   : > { %410 = vst.msk [vmem:[#allocation2 + $0x24] sm:$0xf] %vm240_vm1, %v408_v46 }
  0xf3   : > { %v420_v50 = vld [vmem:[#allocation1 + $0x1] ss:$2 sm:$0xff] }
  0xf4   : > { %421 = vrot.lane.b32.xlu1 %v420_v50, %s1228_s27  ;;  %432 = vst.sshfl [vmem:[#allocation1] sm:$0xff pattern:$0x75316420] %v430_v49 }
  0xfb   : > { %v434_v53 = vld [vmem:[#allocation1 + $0x1] ss:$2 sm:$0xff] }
  0xfc   : > { %444 = vst.sshfl [vmem:[#allocation1] sm:$0xff pattern:$0x75316420] %v442_v52 }
  0xfd   : > { %436 = vst.msk [vmem:[#allocation2 + $0x28] sm:$0xf] %vm240_vm1, %v434_v53 }
  0xfe   : > { %v324_v54 = vpop.permute.xlu2 %323 }
  0xff   : > { %326 = vst.msk [vmem:[#allocation2 + $0x10] sm:$0xf] %vm253_vm2, %v324_v54 }
 0x103   : > { %v446_v55 = vld [vmem:[#allocation1 + $0x1] ss:$2 sm:$0xff] }
 0x104   : > { %447 = vrot.lane.b32.xlu2 %v446_v55, %s1228_s27  ;;  %478 = vst.sshfl [vmem:[#allocation1] sm:$0xff pattern:$0x75316420] %v476_v39 }
 0x10b   : > { %v480_v60 = vld [vmem:[#allocation1 + $0x1] ss:$2 sm:$0xff] }
 0x10c   : > { %482 = vst.msk [vmem:[#allocation2 + $0x34] sm:$0xf] %vm240_vm1, %v480_v60  ;;  %385 = vrot.lane.b32.xlu2 %v383_v38, %s1228_s27 }
 0x10d   : > { %490 = vst.sshfl [vmem:[#allocation1] sm:$0xff pattern:$0x75316420] %v488_v57 }
 0x10e   : > { %v251_v62 = vpop.permute.xlu0 %250 }
 0x10f   : > { %254 = vst.msk [vmem:[#allocation2] sm:$0xf] %vm253_vm2, %v251_v62 }
 0x114   : > { %v492_v2 = vld [vmem:[#allocation1 + $0x1] ss:$2 sm:$0xff] }
 0x115   : > { %493 = vrot.lane.b32.xlu1 %v492_v2, %s1228_s27  ;;  %504 = vst.sshfl [vmem:[#allocation1] sm:$0xff pattern:$0x75316420] %v502_v0 }
 0x116   : > { %v314_v47 = vpop.permute.xlu1 %313 }
 0x117   : > { %316 = vst.msk [vmem:[#allocation2 + $0xc] sm:$0xf] %vm253_vm2, %v314_v47 }
 0x11c   : > { %v506_v5 = vld [vmem:[#allocation1 + $0x1] ss:$2 sm:$0xff] }
 0x11d   : > { %508 = vst.msk [vmem:[#allocation2 + $0x38] sm:$0xf] %vm240_vm1, %v506_v5 }
 0x11e   : > { %516 = vst.sshfl [vmem:[#allocation1] sm:$0xff pattern:$0x75316420] %v514_v3 }
 0x11f   : > { %v396_v6 = vpop.permute.xlu0 %395 }
 0x120   : > { %398 = vst.msk [vmem:[#allocation2 + $0x20] sm:$0xf] %vm253_vm2, %v396_v6 }
 0x125   : > { %v518_v58 = vld [vmem:[#allocation1 + $0x1] ss:$2 sm:$0xff] }
 0x126   : > { %519 = vrot.lane.b32.xlu2 %v518_v58, %s1228_s27 }
 0x127   : > { %v278_v7 = vpop.permute.xlu0 %277 }
 0x128   : > { %280 = vst.msk [vmem:[#allocation2 + $0x4] sm:$0xf] %vm253_vm2, %v278_v7 }
 0x12e   : > { %v350_v8 = vpop.permute.xlu2 %349 }
 0x12f   : > { %v1402_v9 = vld [vmem:[#allocation2] sm:$0xff]  ;;  %352 = vst.msk [vmem:[#allocation2 + $0x14] sm:$0xf] %vm253_vm2, %v350_v8  ;;  %v458_v4 = vpop.permute.xlu0 %457 }
 0x130   : > { %549 = vst [vmem:[#allocation1] ss:$2 sm:$0xff] %v1402_v9 }
 0x131   : > { %460 = vst.msk [vmem:[#allocation2 + $0x2c] sm:$0xf] %vm253_vm2, %v458_v4 }
 0x136   : > { %v304_v10 = vpop.permute.xlu1 %303  ;;  %v1407_v11 = vld [vmem:[#allocation2 + $0x10] sm:$0xff] }
 0x137   : > { %306 = vst.msk [vmem:[#allocation2 + $0x8] sm:$0xf] %vm253_vm2, %v304_v10  ;;  %v468_v12 = vpop.permute.xlu0 %467  ;;  %v556_v25 = vld.sshfl [vmem:[#allocation1] sm:$0xff pattern:$0x75316420] }
 0x138   : > { %470 = vst.msk [vmem:[#allocation2 + $0x30] sm:$0xf] %vm253_vm2, %v468_v12  ;;  %v557_v26 = vld.sshfl [vmem:[#allocation1 + $0x8] sm:$0xff pattern:$0x75316420]  ;;  %v593_v21 = vsel %vm592_vm3, %v556_v25, 0.0 }
 0x139   : > { %553 = vst [vmem:[#allocation1 + $0x20] ss:$2 sm:$0xff] %v1407_v11  ;;  %v594_v31 = vsel %vm592_vm3, %v557_v26, 0.0 }
 0x13a   : > { %v595_v33 = vadd.f32 %v594_v31, %v593_v21 }
 0x13e   : > { %v534_v13 = vld [vmem:[#allocation2 + $0x8] sm:$0xff] }
 0x13f   : > { %551 = vst [vmem:[#allocation1 + $0x10] ss:$2 sm:$0xff] %v534_v13  ;;  %v530_v15 = vpop.permute.xlu0 %529 }
 0x140   : > { %532 = vst.msk [vmem:[#allocation2 + $0x3c] sm:$0xf] %vm253_vm2, %v530_v15  ;;  %v560_v43 = vld.sshfl [vmem:[#allocation1 + $0x20] sm:$0xff pattern:$0x75316420] }
 0x141   : > { %v561_v19 = vld.sshfl [vmem:[#allocation1 + $0x28] sm:$0xff pattern:$0x75316420]  ;;  %v600_v41 = vsel %vm592_vm3, %v560_v43, 0.0 }
 0x142   : > { %v602_v50 = vsel %vm592_vm3, %v561_v19, 0.0 }
 0x146   : > { %v558_v17 = vld.sshfl [vmem:[#allocation1 + $0x10] sm:$0xff pattern:$0x75316420]  ;;  %v559_v18 = vld.sshfl [vmem:[#allocation1 + $0x18] sm:$0xff pattern:$0x75316420] }
 0x147   : > { %v596_v32 = vsel %vm592_vm3, %v558_v17, 0.0  ;;  %v598_v42 = vsel %vm592_vm3, %v559_v18, 0.0 }
 0x148   : > { %v597_v34 = vadd.f32 %v596_v32, %v595_v33 }
 0x14a   : > { %v599_v44 = vadd.f32 %v598_v42, %v597_v34 }
 0x14c   : > { %v601_v46 = vadd.f32 %v600_v41, %v599_v44 }
 0x14e   : > { %v603_v54 = vadd.f32 %v602_v50, %v601_v46 }
 0x156   : > { %v376_v14 = vpop.permute.xlu1 %375 }
 0x157   : > { %378 = vst.msk [vmem:[#allocation2 + $0x18] sm:$0xf] %vm253_vm2, %v376_v14 }
 0x15e   : > { %v448_v16 = vpop.permute.xlu2 %447 }
 0x15f   : > { %450 = vst.msk [vmem:[#allocation2 + $0x28] sm:$0xf] %vm253_vm2, %v448_v16 }
 0x166   : > { %v538_v22 = vld [vmem:[#allocation2 + $0x28] sm:$0xff]  ;;  %v422_v23 = vpop.permute.xlu1 %421  ;;  %v386_v24 = vpop.permute.xlu2 %385 }
 0x167   : > { %565 = vst [vmem:[#allocation1 + $0x10] ss:$2 sm:$0xff] %v538_v22 }
 0x168   : > { %424 = vst.msk [vmem:[#allocation2 + $0x24] sm:$0xf] %vm253_vm2, %v422_v23 }
 0x169   : > { %388 = vst.msk [vmem:[#allocation2 + $0x1c] sm:$0xf] %vm253_vm2, %v386_v24 }
 0x16e   : > { %v1417_v27 = vld.sshfl [vmem:[#allocation1 + $0x10] sm:$0xff pattern:$0x75316420]  ;;  %v1419_v28 = vld.sshfl [vmem:[#allocation1 + $0x18] sm:$0xff pattern:$0x75316420] }
 0x16f   : > { %630 = vst [vmem:[#allocation1 + $0x10] ss:$2 sm:$0xff] %v534_v13  ;;  %v537_v29 = vld [vmem:[#allocation2 + $0x20] sm:$0xff]  ;;  %v612_v7 = vsel %vm592_vm3, %v1417_v27, 0.0  ;;  %v614_v4 = vsel %vm592_vm3, %v1419_v28, 0.0 }
 0x170   : > { %564 = vst [vmem:[#allocation1] ss:$2 sm:$0xff] %v537_v29  ;;  %v1421_v30 = vld [vmem:[#allocation2 + $0x18] sm:$0xff] }
 0x171   : > { %555 = vst [vmem:[#allocation1 + $0x30] ss:$2 sm:$0xff] %v1421_v30 }
 0x176   : > { %v637_v20 = vld.sshfl [vmem:[#allocation1 + $0x10] sm:$0xff pattern:$0x75316420]  ;;  %v1427_v35 = vld.sshfl [vmem:[#allocation1 + $0x18] sm:$0xff pattern:$0x75316420] }
 0x177   : > { %644 = vst [vmem:[#allocation1 + $0x10] ss:$2 sm:$0xff] %v538_v22  ;;  %v568_v36 = vld.sshfl [vmem:[#allocation1] sm:$0xff pattern:$0x75316420] }
 0x178   : > { %v569_v37 = vld.sshfl [vmem:[#allocation1 + $0x8] sm:$0xff pattern:$0x75316420]  ;;  %v562_v45 = vld.sshfl [vmem:[#allocation1 + $0x30] sm:$0xff pattern:$0x75316420] }
 0x179   : > { %628 = vst [vmem:[#allocation1] ss:$2 sm:$0xff] %v1402_v9  ;;  %v604_v51 = vsel %vm592_vm3, %v562_v45, 0.0  ;;  %v563_v39 = vld.sshfl [vmem:[#allocation1 + $0x38] sm:$0xff pattern:$0x75316420] }
 0x17a   : > { %v605_v55 = vadd.f32 %v604_v51, %v603_v54  ;;  %v606_v56 = vsel %vm592_vm3, %v563_v39, 0.0  ;;  %v608_v1 = vsel %vm592_vm3, %v568_v36, 0.0  ;;  %v610_v47 = vsel %vm592_vm3, %v569_v37, 0.0 }
 0x17c   : > { %v607_v60 = vadd.f32 %v606_v56, %v605_v55 }
 0x17e   : > { %v1432_v48 = vld.sshfl [vmem:[#allocation1 + $0x10] sm:$0xff pattern:$0x75316420]  ;;  %v1434_v49 = vld.sshfl [vmem:[#allocation1 + $0x18] sm:$0xff pattern:$0x75316420]  ;;  %v609_v2 = vadd.f32 %v608_v1, %v607_v60 }
 0x17f   : > { %673 = vst [vmem:[#allocation1 + $0x10] ss:$2 sm:$0xff] %v534_v13 }
 0x180   : > { %v635_v52 = vld.sshfl [vmem:[#allocation1] sm:$0xff pattern:$0x75316420]  ;;  %v636_v53 = vld.sshfl [vmem:[#allocation1 + $0x8] sm:$0xff pattern:$0x75316420]  ;;  %v520_v40 = vpop.permute.xlu2 %519  ;;  %v611_v3 = vadd.f32 %v610_v47, %v609_v2 }
 0x181   : > { %643 = vst [vmem:[#allocation1] ss:$2 sm:$0xff] %v537_v29 }
 0x182   : > { %522 = vst.msk [vmem:[#allocation2 + $0x38] sm:$0xf] %vm253_vm2, %v520_v40 }
 0x186   : > { %v680_v38 = vld.sshfl [vmem:[#allocation1 + $0x10] sm:$0xff pattern:$0x75316420]  ;;  %v681_v57 = vld.sshfl [vmem:[#allocation1 + $0x18] sm:$0xff pattern:$0x75316420] }
 0x187   : > { %v494_v59 = vpop.permute.xlu1 %493  ;;  %769 = vmatpush.xpose.msra.mxu3 %v680_v38  ;;  %687 = vst [vmem:[#allocation1 + $0x10] ss:$2 sm:$0xff] %v538_v22 }
 0x188   : > { %496 = vst.msk [vmem:[#allocation2 + $0x34] sm:$0xf] %vm253_vm2, %v494_v59  ;;  %v1441_v62 = vld.sshfl [vmem:[#allocation1] sm:$0xff pattern:$0x75316420] }
 0x189   : > { %v1443_v63 = vld.sshfl [vmem:[#allocation1 + $0x8] sm:$0xff pattern:$0x75316420]  ;;  %v540_v0 = vld [vmem:[#allocation2 + $0x38] sm:$0xff] }
 0x18a   : > { %770 = vmatmul.f32.vlgmr.msra.gmra.mxu3 %v637_v20  ;;  %671 = vst [vmem:[#allocation1] ss:$2 sm:$0xff] %v1402_v9  ;;  %v613_v9 = vadd.f32 %v612_v7, %v611_v3 }
 0x18b   : > { %567 = vst [vmem:[#allocation1 + $0x30] ss:$2 sm:$0xff] %v540_v0 }
 0x18c   : > { %v615_v13 = vadd.f32 %v614_v4, %v613_v9 }
 0x18e   : > { %v692_v42 = vld.sshfl [vmem:[#allocation1 + $0x10] sm:$0xff pattern:$0x75316420] }
 0x18f   : > { %v539_v61 = vld [vmem:[#allocation2 + $0x30] sm:$0xff] }
 0x190   : > { %566 = vst [vmem:[#allocation1 + $0x20] ss:$2 sm:$0xff] %v539_v61 }
 0x191   : > { %v678_v5 = vld.sshfl [vmem:[#allocation1] sm:$0xff pattern:$0x75316420]  ;;  %v679_v6 = vld.sshfl [vmem:[#allocation1 + $0x8] sm:$0xff pattern:$0x75316420] }
 0x192   : > { %729 = vmatpush.xpose.msra.mxu1 %v678_v5  ;;  %749 = vmatpush.xpose.msra.mxu2 %v679_v6  ;;  %686 = vst [vmem:[#allocation1] ss:$2 sm:$0xff] %v537_v29  ;;  %v574_v58 = vld.sshfl [vmem:[#allocation1 + $0x30] sm:$0xff pattern:$0x75316420] }
 0x193   : > { %v575_v8 = vld.sshfl [vmem:[#allocation1 + $0x38] sm:$0xff pattern:$0x75316420]  ;;  %v620_v23 = vsel %vm592_vm3, %v574_v58, 0.0 }
 0x194   : > { %634 = vst [vmem:[#allocation1 + $0x30] ss:$2 sm:$0xff] %v1421_v30  ;;  %v622_v25 = vsel %vm592_vm3, %v575_v8, 0.0 }
 0x195   : > { %730 = vmatmul.f32.vlgmr.msra.gmra.mxu1 %v635_v52  ;;  %750 = vmatmul.f32.vlgmr.msra.gmra.mxu2 %v636_v53 }
 0x196   : > { %789 = vmatpush.xpose.msrb.mxu1 %v681_v57 }
 0x197   : > { %v572_v10 = vld.sshfl [vmem:[#allocation1 + $0x20] sm:$0xff pattern:$0x75316420]  ;;  %v573_v12 = vld.sshfl [vmem:[#allocation1 + $0x28] sm:$0xff pattern:$0x75316420] }
 0x198   : > { %v616_v14 = vsel %vm592_vm3, %v572_v10, 0.0  ;;  %632 = vst [vmem:[#allocation1 + $0x20] ss:$2 sm:$0xff] %v1407_v11  ;;  %v618_v16 = vsel %vm592_vm3, %v573_v12, 0.0 }
 0x199   : > { %v617_v15 = vadd.f32 %v616_v14, %v615_v13  ;;  %v691_v20 = vld.sshfl [vmem:[#allocation1 + $0x8] sm:$0xff pattern:$0x75316420]  ;;  %v690_v37 = vld.sshfl [vmem:[#allocation1] sm:$0xff pattern:$0x75316420] }
 0x19b   : > { %v619_v17 = vadd.f32 %v618_v16, %v617_v15  ;;  %v641_v18 = vld.sshfl [vmem:[#allocation1 + $0x30] sm:$0xff pattern:$0x75316420]  ;;  %v642_v22 = vld.sshfl [vmem:[#allocation1 + $0x38] sm:$0xff pattern:$0x75316420] }
 0x19c   : > { %646 = vst [vmem:[#allocation1 + $0x30] ss:$2 sm:$0xff] %v540_v0 }
 0x19d   : > { %790 = vmatmul.f32.vlgmr.msrb.gmra.mxu1 %v1427_v35  ;;  %v621_v24 = vadd.f32 %v620_v23, %v619_v17 }
 0x19f   : > { %v623_v26 = vadd.f32 %v622_v25, %v621_v24  ;;  %v639_v27 = vld.sshfl [vmem:[#allocation1 + $0x20] sm:$0xff pattern:$0x75316420]  ;;  %v640_v28 = vld.sshfl [vmem:[#allocation1 + $0x28] sm:$0xff pattern:$0x75316420] }
 0x1a0   : > { %645 = vst [vmem:[#allocation1 + $0x20] ss:$2 sm:$0xff] %v539_v61 }
 0x1a1   : > { %624 = vadd.xlane.f32.xlu1 %v623_v26 }
 0x1a3   : > { %v653_v29 = vld.sshfl [vmem:[#allocation1 + $0x30] sm:$0xff pattern:$0x75316420]  ;;  %v654_v21 = vld.sshfl [vmem:[#allocation1 + $0x38] sm:$0xff pattern:$0x75316420] }
 0x1a4   : > { %677 = vst [vmem:[#allocation1 + $0x30] ss:$2 sm:$0xff] %v1421_v30 }
 0x1a7   : > { %v651_v31 = vld.sshfl [vmem:[#allocation1 + $0x20] sm:$0xff pattern:$0x75316420]  ;;  %v652_v32 = vld.sshfl [vmem:[#allocation1 + $0x28] sm:$0xff pattern:$0x75316420] }
 0x1a8   : > { %675 = vst [vmem:[#allocation1 + $0x20] ss:$2 sm:$0xff] %v1407_v11  ;;  %v693_v11 = vld.sshfl [vmem:[#allocation1 + $0x18] sm:$0xff pattern:$0x75316420] }
 0x1ab   : > { %v685_v33 = vld.sshfl [vmem:[#allocation1 + $0x38] sm:$0xff pattern:$0x75316420]  ;;  %v684_v34 = vld.sshfl [vmem:[#allocation1 + $0x30] sm:$0xff pattern:$0x75316420] }
 0x1ac   : > { %849 = vmatpush.xpose.msra.mxu1 %v684_v34  ;;  %689 = vst [vmem:[#allocation1 + $0x30] ss:$2 sm:$0xff] %v540_v0 }
 0x1af   : > { %850 = vmatmul.f32.vlgmr.msra.gmra.mxu1 %v641_v18  ;;  %v682_v35 = vld.sshfl [vmem:[#allocation1 + $0x20] sm:$0xff pattern:$0x75316420]  ;;  %v683_v36 = vld.sshfl [vmem:[#allocation1 + $0x28] sm:$0xff pattern:$0x75316420] }
 0x1b0   : > { %909 = vmatpush.xpose.msrb.mxu1 %v691_v20  ;;  %809 = vmatpush.xpose.msrb.mxu2 %v682_v35  ;;  %688 = vst [vmem:[#allocation1 + $0x20] ss:$2 sm:$0xff] %v539_v61 }
 0x1b1   : > { %829 = vmatpush.xpose.msrb.mxu3 %v683_v36 }
 0x1b3   : > { %v697_v30 = vld.sshfl [vmem:[#allocation1 + $0x38] sm:$0xff pattern:$0x75316420]  ;;  %810 = vmatmul.f32.vlgmr.msrb.gmra.mxu2 %v639_v27  ;;  %v696_v19 = vld.sshfl [vmem:[#allocation1 + $0x30] sm:$0xff pattern:$0x75316420] }
 0x1b4   : > { %869 = vmatpush.xpose.msra.mxu2 %v685_v33  ;;  %830 = vmatmul.f32.vlgmr.msrb.gmra.mxu3 %v640_v28 }
 0x1b5   : > { %889 = vmatpush.xpose.msra.mxu3 %v690_v37  ;;  %1029 = vmatpush.xpose.msrb.mxu0 %v697_v30 }
 0x1b7   : > { %910 = vmatmul.f32.vlgmr.msrb.gmra.mxu1 %v1443_v63  ;;  %v694_v43 = vld.sshfl [vmem:[#allocation1 + $0x20] sm:$0xff pattern:$0x75316420]  ;;  %v695_v44 = vld.sshfl [vmem:[#allocation1 + $0x28] sm:$0xff pattern:$0x75316420] }
 0x1b8   : > { %929 = vmatpush.xpose.msrb.mxu2 %v692_v42  ;;  %1030 = vmatmul.f32.vlgmr.msrb.gmra.mxu0 %v654_v21 }
 0x1b9   : > { %949 = vmatpush.xpose.msrb.mxu3 %v693_v11  ;;  %969 = vmatpush.xpose.msra.mxu1 %v694_v43 }
 0x1bb   : > { %870 = vmatmul.f32.vlgmr.msra.gmra.mxu2 %v642_v22 }
 0x1bc   : > { %890 = vmatmul.f32.vlgmr.msra.gmra.mxu3 %v1441_v62  ;;  %989 = vmatpush.xpose.msra.mxu2 %v695_v44 }
 0x1bd   : > { %1009 = vmatpush.xpose.msra.mxu3 %v696_v19 }
 0x1bf   : > { %970 = vmatmul.f32.vlgmr.msra.gmra.mxu1 %v651_v31 }
 0x1c3   : > { %930 = vmatmul.f32.vlgmr.msrb.gmra.mxu2 %v1432_v48 }
 0x1c4   : > { %950 = vmatmul.f32.vlgmr.msrb.gmra.mxu3 %v1434_v49 }
 0x1cb   : > { %990 = vmatmul.f32.vlgmr.msra.gmra.mxu2 %v652_v32 }
 0x1cc   : > { %1010 = vmatmul.f32.vlgmr.msra.gmra.mxu3 %v653_v29 }
 0x20d   : > { %v771_v48 = vpop.f32.mrf.mxu3 }
 0x212   : > { %v731_v41 = vpop.f32.mrf.mxu1 }
 0x214   : > { %v625_v45 = vpop.xlane.xlu1 %624 }
 0x215   : > { %627 = vst.msk [vmem:[%s1470_s5] sm:$0xf] %vm626_vm4, %v625_v45 }
 0x218   : > { %v751_v46 = vpop.f32.mrf.mxu2 }
 0x219   : > { %v752_v50 = vadd.f32 %v751_v46, %v731_v41 }
 0x21a   : > { %v791_v51 = vpop.f32.mrf.mxu1 }
 0x21b   : > { %v772_v49 = vadd.f32 %v771_v48, %v752_v50 }
 0x21d   : > { %v792_v52 = vadd.f32 %v791_v51, %v772_v49 }
 0x22c   : > { %v851_v39 = vpop.f32.mrf.mxu1 }
 0x234   : > { %v911_v62 = vpop.f32.mrf.mxu1 }
 0x235   : > { %v1031_v8 = vpop.f32.mrf.mxu0 }
 0x236   : > { %v811_v53 = vpop.f32.mrf.mxu2 }
 0x237   : > { %v831_v40 = vpop.f32.mrf.mxu3  ;;  %v812_v54 = vadd.f32 %v811_v53, %v792_v52 }
 0x239   : > { %v832_v55 = vadd.f32 %v831_v40, %v812_v54 }
 0x23b   : > { %v852_v56 = vadd.f32 %v851_v39, %v832_v55 }
 0x23c   : > { %v971_v61 = vpop.f32.mrf.mxu1 }
 0x23e   : > { %v871_v38 = vpop.f32.mrf.mxu2 }
 0x23f   : > { %v891_v57 = vpop.f32.mrf.mxu3  ;;  %v872_v59 = vadd.f32 %v871_v38, %v852_v56 }
 0x241   : > { %v892_v60 = vadd.f32 %v891_v57, %v872_v59 }
 0x243   : > { %v912_v63 = vadd.f32 %v911_v62, %v892_v60 }
 0x246   : > { %v931_v0 = vpop.f32.mrf.mxu2 }
 0x247   : > { %v951_v1 = vpop.f32.mrf.mxu3  ;;  %v932_v2 = vadd.f32 %v931_v0, %v912_v63 }
 0x249   : > { %v952_v47 = vadd.f32 %v951_v1, %v932_v2 }
 0x24b   : > { %v972_v3 = vadd.f32 %v971_v61, %v952_v47 }
 0x24e   : > { %v991_v5 = vpop.f32.mrf.mxu2 }
 0x24f   : > { %v992_v6 = vadd.f32 %v991_v5, %v972_v3  ;;  %v1011_v58 = vpop.f32.mrf.mxu3 }
 0x251   : > { %v1012_v7 = vadd.f32 %v1011_v58, %v992_v6 }
 0x253   : > { %v1032_v9 = vadd.f32 %v1031_v8, %v1012_v7 }
 0x255   : > { %1035 = vrot.lane.b32.xlu2 %v1032_v9, %s1229_s6 }
 0x2af   : > { %v1036_v4 = vpop.permute.xlu2 %1035 }
 0x2b0   : > { %1039 = vst.msk [vmem:[%s1470_s5] sm:$0xf] %vm1038_vm5, %v1036_v4 }
 0x2b1 PF: > { %s12_s13 = sadd.s32 1, %s1226_s13   ;;  %s1492_s9 = smov %s1218_s11 }
 0x2b2   : > { %p9_p7 = scmp.ge.s32.totalorder %s12_s13, 6   ;;  %s1493_s10 = smov %s1222_s12 }
 0x2b3   : > { %s1494_s11 = smov %s1497_s14  ;;  %s1495_s12 = smov %s1501_s15 }
 0x2b4   :  { %11 = sbr.rel (!%p9_p7) target bundleno = 3 (0x3), region = 83 }

</bundles_post_ra>
